<compile_context>
chip_gen: v7x
topology: tpu7x:2x2x1
jax: 0.10.0
libtpu: 0.0.40
codegen_flags: <defaults>
</compile_context>

<pallas_src>
import functools

import jax
import jax.numpy as jnp
from jax import lax
from jax.experimental import pallas as pl
from jax.experimental.pallas import tpu as pltpu


MXU_DTYPE = jnp.bfloat16   # matmul operand dtype; accumulation stays f32 on the MXU
LANES = 128                # slab width (lane-dense)


# ---------------------------------------------------------------------------
# Fused forward kernel (one grid step == one batch element)
# ---------------------------------------------------------------------------

def _fused_forward_kernel(x_ref, w_ref, v_ref, o_ref, *, hpc, layout):
    (P, dim, heads, dh, mlp_layers, depth, mlp_dim, pool, pos_embed) = hpc
    inner = heads * dh
    N = layout['N']          # real token count (P + 1)
    NP = layout['NP']        # sublane-padded token count
    woff, voff = layout['w'], layout['v']

    def W(name):             # static slice of the bf16 weight slab
        r, nr, nc = woff[name]
        return w_ref[r:r + nr, 0:nc]

    def V(name):             # static slice of the f32 bias/LN/embedding slab
        r, nr, nc = voff[name]
        return v_ref[r:r + nr, 0:nc]

    def mm(a, b):            # bf16 operands into the MXU, f32 accumulation
        return jnp.dot(a.astype(MXU_DTYPE), b, preferred_element_type=jnp.float32)

    def layernorm(x, w, b):  # f32 LayerNorm, eps matches torch default
        mu = jnp.mean(x, axis=-1, keepdims=True)
        var = jnp.mean(jnp.square(x - mu), axis=-1, keepdims=True)
        return (x - mu) * lax.rsqrt(var + 1e-5) * w + b

    # ---- patch encoder ('linear'): MLP stack + projection to model_dim ----
    h = x_ref[0]                                           # (P, feat) f32
    for i in range(mlp_layers):
        h = mm(h, W(f'mlp_w{i}')) + V(f'mlp_b{i}')
    h = mm(h, W('enc_w')) + V('enc_b')                     # (P, dim)

    # ---- cls token + positional embedding, padded to NP sublane-aligned rows ----
    pieces = [V('cls'), h]
    if NP - 1 - P > 0:
        pieces.append(jnp.zeros((NP - 1 - P, dim), jnp.float32))
    x = jnp.concatenate(pieces, axis=0)                    # (NP, dim)
    if pos_embed:
        x = x + V('pos')                                   # padded pos rows are zero

    # key-mask bias: padded tokens never contribute as attention keys
    if NP > N:
        col = lax.broadcasted_iota(jnp.int32, (1, NP), 1)
        kbias = jnp.where(col < N, 0.0, -1e30).astype(jnp.float32)
    else:
        kbias = None

    # ---- transformer blocks ----
    for li in range(depth):
        # PreNorm + Attention (residual).  to_qkv has no bias; Q is pre-scaled.
        xn = layernorm(x, V(f'ln1w{li}'), V(f'ln1b{li}'))
        qkv = mm(xn, W(f'wqkv{li}')).astype(MXU_DTYPE)     # (NP, 3*inner) bf16, cast once
        outs = []
        for hd in range(heads):
            q = qkv[:, hd * dh:(hd + 1) * dh]
            k = qkv[:, inner + hd * dh:inner + (hd + 1) * dh]
            v = qkv[:, 2 * inner + hd * dh:2 * inner + (hd + 1) * dh]
            s = jnp.einsum('nd,md->nm', q, k,
                           preferred_element_type=jnp.float32)          # (NP, NP)
            if kbias is not None:
                s = s + kbias
            s = s - jnp.max(s, axis=-1, keepdims=True)
            e = jnp.exp(s)
            p = e * pl.reciprocal(jnp.sum(e, axis=-1, keepdims=True), approx=True)
            outs.append(jnp.dot(p.astype(MXU_DTYPE), v,
                                preferred_element_type=jnp.float32))    # (NP, dh)
        ho = jnp.concatenate(outs, axis=-1)                # (NP, inner)
        x = x + mm(ho, W(f'wo{li}')) + V(f'bo{li}')        # single fused out-projection

        # PreNorm + FeedForward (residual); exact GELU = torch nn.GELU default.
        xn2 = layernorm(x, V(f'ln2w{li}'), V(f'ln2b{li}'))
        h1 = mm(xn2, W(f'w1{li}')) + V(f'b1{li}')
        h1 = 0.5 * h1 * (1.0 + lax.erf(h1 * (2.0 ** -0.5)))
        x = x + mm(h1, W(f'w2{li}')) + V(f'b2{li}')

    # ---- pool (over the N real tokens only) + MLP head ----
    if pool == 'mean':
        pooled = jnp.mean(x[0:N, :], axis=0, keepdims=True)   # (1, dim)
    else:
        pooled = x[0:1, :]
    pn = layernorm(pooled, V('head_lnw'), V('head_lnb'))
    logits = mm(pn, W('head_w')) + V('head_b')                 # (1, 128) lane-dense
    o_ref[0] = logits


# ---------------------------------------------------------------------------
# One-time parameter packing into two VMEM slabs
# ---------------------------------------------------------------------------

def _pad_cols(a, cols=LANES):
    a = jnp.asarray(a, jnp.float32)
    if a.ndim == 1:
        a = a.reshape(1, -1)
    r, c = a.shape
    assert c <= cols, f"row width {c} exceeds slab width {cols}"
    if c == cols:
        return a
    return jnp.pad(a, ((0, 0), (0, cols - c)))


def pack_params(params, hp):
    dim = hp['model_dim']
    heads, dh = hp['heads'], hp['dim_head']
    inner = heads * dh
    P = hp['nb_patches']
    N = P + 1
    NP = ((N + 7) // 8) * 8
    depth = hp['depth']
    scale = dh ** -0.5
    assert hp['nb_classes'] <= LANES

    w_blocks, w_off = [], {}
    w_cursor = 0

    def addw(name, mat):
        nonlocal w_cursor
        mat = jnp.asarray(mat, jnp.float32)
        w_off[name] = (w_cursor, mat.shape[0], mat.shape[1])
        w_blocks.append(_pad_cols(mat))
        w_cursor += mat.shape[0]

    v_blocks, v_off = [], {}
    v_cursor = 0

    def addv(name, vec):
        nonlocal v_cursor
        vec = jnp.asarray(vec, jnp.float32)
        if vec.ndim == 1:
            vec = vec.reshape(1, -1)
        v_off[name] = (v_cursor, vec.shape[0], vec.shape[1])
        v_blocks.append(_pad_cols(vec))
        v_cursor += vec.shape[0]

    # patch-encoder MLP stack + projection
    for i, (w, b) in enumerate(params['mlp_linears']):
        addw(f'mlp_w{i}', w)
        addv(f'mlp_b{i}', b)
    addw('enc_w', params['enc_w'])
    addv('enc_b', params['enc_b'])

    # cls token + row-padded positional embedding
    addv('cls', params['cls_token'].reshape(1, dim))
    pos = jnp.asarray(params['pos_embedding'], jnp.float32).reshape(N, dim)
    addv('pos', jnp.pad(pos, ((0, NP - N), (0, 0))))

    # transformer layers
    for li, lp in enumerate(params['layers']):
        wqkv = lp['wqkv'].at[:, :inner].multiply(scale)    # fold 1/sqrt(dh) into Q
        addw(f'wqkv{li}', wqkv)
        addw(f'wo{li}', lp['wo'])
        addw(f'w1{li}', lp['w1'])
        addw(f'w2{li}', lp['w2'])
        addv(f'ln1w{li}', lp['ln1w'])
        addv(f'ln1b{li}', lp['ln1b'])
        addv(f'bo{li}', lp['bo'])
        addv(f'ln2w{li}', lp['ln2w'])
        addv(f'ln2b{li}', lp['ln2b'])
        addv(f'b1{li}', lp['b1'])
        addv(f'b2{li}', lp['b2'])

    # classifier head, padded to 128 lanes for a lane-dense final store
    head_w = jnp.asarray(params['head_w'], jnp.float32)
    head_w = jnp.pad(head_w, ((0, 0), (0, LANES - head_w.shape[1])))
    head_b = jnp.asarray(params['head_b'], jnp.float32).reshape(1, -1)
    head_b = jnp.pad(head_b, ((0, 0), (0, LANES - head_b.shape[1])))
    addw('head_w', head_w)
    addv('head_lnw', params['head_lnw'])
    addv('head_lnb', params['head_lnb'])
    addv('head_b', head_b)

    def _stack(blocks, cursor, row_align):
        slab = jnp.concatenate(blocks, axis=0)
        pad = (-cursor) % row_align
        if pad:
            slab = jnp.pad(slab, ((0, pad), (0, 0)))
        return slab

    wslab = _stack(w_blocks, w_cursor, 16).astype(MXU_DTYPE)   # bf16 matmul weights
    vslab = _stack(v_blocks, v_cursor, 8)                      # f32 biases/LN/embeddings
    layout = dict(w=w_off, v=v_off, N=N, NP=NP)
    return wslab, vslab, layout


# ---------------------------------------------------------------------------
# Wrapper: pallas_call with a parallel batch grid
# ---------------------------------------------------------------------------

def make_forward(hp, layout):
    P = hp['nb_patches']
    dim = hp['model_dim']
    feat = hp['patch_len'] * hp['n_mels'] * hp['nb_channels']
    C = hp['nb_classes']
    hpc = (P, dim, hp['heads'], hp['dim_head'], hp['mlp_layers'], hp['depth'],
           hp['mlp_dim'], hp['pool'], bool(hp['pos_embed']))
    kernel = functools.partial(_fused_forward_kernel, hpc=hpc, layout=layout)

    def forward(x, wslab, vslab):
        B = x.shape[0] // P
        # '(b p) c f t -> b p (c f t)'
        x3 = x.reshape(B, P, feat).astype(jnp.float32)
        Rw, Rv = wslab.shape[0], vslab.shape[0]
        out = pl.pallas_call(
            kernel,
            out_shape=jax.ShapeDtypeStruct((B, 1, LANES), jnp.float32),
            grid=(B,),
            in_specs=[
                pl.BlockSpec((1, P, feat), lambda b: (b, 0, 0)),     # per-batch block
                pl.BlockSpec((Rw, LANES), lambda b: (0, 0)),          # resident weight slab
                pl.BlockSpec((Rv, LANES), lambda b: (0, 0)),          # resident bias slab
            ],
            out_specs=pl.BlockSpec((1, 1, LANES), lambda b: (b, 0, 0)),
            compiler_params=pltpu.CompilerParams(
                dimension_semantics=("parallel",)),                   # v7x: 2 TCs share B
        )(x3, wslab, vslab)
        return out[:, 0, :C]

    return jax.jit(forward)


# ---------------------------------------------------------------------------
# Parameter init (deterministic, synthetic)
# ---------------------------------------------------------------------------

def init_params(key, hp):
    dim = hp['model_dim']
    inner = hp['heads'] * hp['dim_head']
    mlp_dim = hp['mlp_dim']
    feat = hp['patch_len'] * hp['n_mels'] * hp['nb_channels']

    keys = iter(jax.random.split(key, 64))

    def w_(shape, sc=0.05):
        return sc * jax.random.normal(next(keys), shape, jnp.float32)

    params = {
        'mlp_linears': [(w_((feat, feat)), jnp.zeros((1, feat), jnp.float32))
                        for _ in range(hp['mlp_layers'])],
        'enc_w': w_((feat, dim)),
        'enc_b': jnp.zeros((1, dim), jnp.float32),
        'cls_token': w_((1, 1, dim), 1.0),
        'pos_embedding': w_((1, hp['nb_patches'] + 1, dim), 1.0),
        'head_lnw': jnp.ones((1, dim), jnp.float32),
        'head_lnb': jnp.zeros((1, dim), jnp.float32),
        'head_w': w_((dim, hp['nb_classes'])),
        'head_b': jnp.zeros((1, hp['nb_classes']), jnp.float32),
    }
    layers = []
    for _ in range(hp['depth']):
        layers.append(dict(
            ln1w=jnp.ones((1, dim), jnp.float32),
            ln1b=jnp.zeros((1, dim), jnp.float32),
            wqkv=w_((dim, 3 * inner)),                  # to_qkv has no bias
            wo=w_((inner, dim)),
            bo=jnp.zeros((1, dim), jnp.float32),
            ln2w=jnp.ones((1, dim), jnp.float32),
            ln2b=jnp.zeros((1, dim), jnp.float32),
            w1=w_((dim, mlp_dim)),
            b1=jnp.zeros((1, mlp_dim), jnp.float32),
            w2=w_((mlp_dim, dim)),
            b2=jnp.zeros((1, dim), jnp.float32),
        ))
    params['layers'] = layers
    return params


# ---------------------------------------------------------------------------

if __name__ == "__main__":
    hp = dict(
        model_dim=32, nb_patches=8, nb_channels=1, n_mels=16, patch_len=8,
        instance_norm=False, patch_encoder='linear', mlp_layers=1,
        depth=2, heads=4, dim_head=8, mlp_dim=64,
        dropout=0.0, emb_dropout=0.0, pool='mean', pos_embed=True, nb_classes=5,
    )
    B = 2

    key = jax.random.PRNGKey(0)
    kp, kx = jax.random.split(key)
    params = init_params(kp, hp)
    # One-time packing of all parameters into two slabs (outside the jitted forward).
    wslab, vslab, layout = pack_params(params, hp)
    fwd = make_forward(hp, layout)

    x = jax.random.normal(
        kx,
        (B * hp['nb_patches'], hp['nb_channels'], hp['n_mels'], hp['patch_len']),
        jnp.float32,
    )

    out = jax.block_until_ready(fwd(x, wslab, vslab))
    assert out.shape == (B, hp['nb_classes'])
    print("KERNEL_OK")
</pallas_src>

<mosaic_0001>
module attributes {stable_mosaic.version = 11 : i64} {
  func.func @_fused_forward_kernel(%arg0: i32, %arg1: memref<1x8x128xf32, #tpu.memory_space<vmem>>, %arg2: memref<608x128xbf16, #tpu.memory_space<vmem>>, %arg3: memref<40x128xf32, #tpu.memory_space<vmem>>, %arg4: memref<1x1x128xf32, #tpu.memory_space<vmem>>) attributes {dimension_semantics = [#tpu.dimension_semantics<parallel>], iteration_bounds = array<i64: 2>, scalar_prefetch = 0 : i64, scratch_operands = 0 : i64, tpu.core_type = #tpu.core_type<tc>, window_params = [{transform_indices = @transform_0, window_bounds = array<i64: 1, 8, 128>}, {pipeline_mode = #tpu.pipeline_mode<synchronous>, transform_indices = @transform_1, window_bounds = array<i64: 608, 128>}, {pipeline_mode = #tpu.pipeline_mode<synchronous>, transform_indices = @transform_2, window_bounds = array<i64: 40, 128>}, {transform_indices = @transform_3, window_bounds = array<i64: 1, 1, 128>}]} {
    %c0 = arith.constant 0 : index
    %c0_0 = arith.constant 0 : index
    %c0_1 = arith.constant 0 : index
    %0 = vector.load %arg1[%c0, %c0_0, %c0_1] : memref<1x8x128xf32, #tpu.memory_space<vmem>>, vector<1x8x128xf32>
    %1 = vector.shape_cast %0 : vector<1x8x128xf32> to vector<8x128xf32>
    %c0_2 = arith.constant 0 : index
    %c0_3 = arith.constant 0 : index
    %2 = vector.load %arg2[%c0_2, %c0_3] : memref<608x128xbf16, #tpu.memory_space<vmem>>, vector<128x128xbf16>
    %3 = arith.truncf %1 : vector<8x128xf32> to vector<8x128xbf16>
    %cst = arith.constant dense<0.000000e+00> : vector<8x128xf32>
    %4 = tpu.matmul %3, %2, %cst {dimension_numbers = #tpu.dot_dimension_numbers<[1], [0], [0], [1], [0, 0, 1, 1], [], []>} : vector<8x128xbf16>, vector<128x128xbf16>, vector<8x128xf32> -> vector<8x128xf32>
    %c0_4 = arith.constant 0 : index
    %c0_5 = arith.constant 0 : index
    %5 = vector.load %arg3[%c0_4, %c0_5] : memref<40x128xf32, #tpu.memory_space<vmem>>, vector<1x128xf32>
    %6 = vector.broadcast %5 : vector<1x128xf32> to vector<8x128xf32>
    %7 = arith.addf %4, %6 : vector<8x128xf32>
    %c128 = arith.constant 128 : index
    %c0_6 = arith.constant 0 : index
    %8 = vector.load %arg2[%c128, %c0_6] : memref<608x128xbf16, #tpu.memory_space<vmem>>, vector<128x32xbf16>
    %9 = arith.truncf %7 : vector<8x128xf32> to vector<8x128xbf16>
    %cst_7 = arith.constant dense<0.000000e+00> : vector<8x32xf32>
    %10 = tpu.matmul %9, %8, %cst_7 {dimension_numbers = #tpu.dot_dimension_numbers<[1], [0], [0], [1], [0, 0, 1, 1], [], []>} : vector<8x128xbf16>, vector<128x32xbf16>, vector<8x32xf32> -> vector<8x32xf32>
    %c1 = arith.constant 1 : index
    %c0_8 = arith.constant 0 : index
    %11 = vector.load %arg3[%c1, %c0_8] : memref<40x128xf32, #tpu.memory_space<vmem>>, vector<1x32xf32>
    %12 = vector.broadcast %11 : vector<1x32xf32> to vector<8x32xf32>
    %13 = arith.addf %10, %12 : vector<8x32xf32>
    %c2 = arith.constant 2 : index
    %c0_9 = arith.constant 0 : index
    %14 = vector.load %arg3[%c2, %c0_9] : memref<40x128xf32, #tpu.memory_space<vmem>>, vector<1x32xf32>
    %cst_10 = arith.constant 0.000000e+00 : f32
    %15 = vector.broadcast %cst_10 : f32 to vector<7x32xf32>
    %16 = tpu.concatenate %14, %13, %15 in 0 : vector<1x32xf32>, vector<8x32xf32>, vector<7x32xf32> -> vector<16x32xf32>
    %c3 = arith.constant 3 : index
    %c0_11 = arith.constant 0 : index
    %17 = vector.load %arg3[%c3, %c0_11] : memref<40x128xf32, #tpu.memory_space<vmem>>, vector<16x32xf32>
    %18 = arith.addf %16, %17 : vector<16x32xf32>
    %19 = tpu.iota {dimensions = array<i32: 1>} : vector<1x16xi32>
    %c9_i32 = arith.constant 9 : i32
    %20 = vector.broadcast %c9_i32 : i32 to vector<1x16xi32>
    %21 = arith.cmpi slt, %19, %20 : vector<1x16xi32>
    %cst_12 = arith.constant 0.000000e+00 : f32
    %cst_13 = arith.constant -1.000000e+30 : f32
    %22 = vector.broadcast %cst_12 : f32 to vector<1x16xf32>
    %23 = vector.broadcast %cst_13 : f32 to vector<1x16xf32>
    %24 = arith.select %21, %22, %23 : vector<1x16xi1>, vector<1x16xf32>
    %c19 = arith.constant 19 : index
    %c0_14 = arith.constant 0 : index
    %25 = vector.load %arg3[%c19, %c0_14] : memref<40x128xf32, #tpu.memory_space<vmem>>, vector<1x32xf32>
    %c20 = arith.constant 20 : index
    %c0_15 = arith.constant 0 : index
    %26 = vector.load %arg3[%c20, %c0_15] : memref<40x128xf32, #tpu.memory_space<vmem>>, vector<1x32xf32>
    %cst_16 = arith.constant dense<0.000000e+00> : vector<16xf32>
    %27 = vector.multi_reduction <add>, %18, %cst_16 [1] : vector<16x32xf32> to vector<16xf32>
    %28 = vector.shape_cast %27 : vector<16xf32> to vector<16x1xf32>
    %cst_17 = arith.constant 3.200000e+01 : f32
    %29 = vector.broadcast %cst_17 : f32 to vector<16x1xf32>
    %30 = arith.divf %28, %29 : vector<16x1xf32>
    %31 = vector.broadcast %30 : vector<16x1xf32> to vector<16x32xf32>
    %32 = arith.subf %18, %31 : vector<16x32xf32>
    %33 = arith.mulf %32, %32 : vector<16x32xf32>
    %cst_18 = arith.constant dense<0.000000e+00> : vector<16xf32>
    %34 = vector.multi_reduction <add>, %33, %cst_18 [1] : vector<16x32xf32> to vector<16xf32>
    %35 = vector.shape_cast %34 : vector<16xf32> to vector<16x1xf32>
    %cst_19 = arith.constant 3.200000e+01 : f32
    %36 = vector.broadcast %cst_19 : f32 to vector<16x1xf32>
    %37 = arith.divf %35, %36 : vector<16x1xf32>
    %38 = vector.broadcast %30 : vector<16x1xf32> to vector<16x32xf32>
    %39 = arith.subf %18, %38 : vector<16x32xf32>
    %cst_20 = arith.constant 9.99999974E-6 : f32
    %40 = vector.broadcast %cst_20 : f32 to vector<16x1xf32>
    %41 = arith.addf %37, %40 : vector<16x1xf32>
    %42 = math.rsqrt %41 : vector<16x1xf32>
    %43 = vector.broadcast %42 : vector<16x1xf32> to vector<16x32xf32>
    %44 = arith.mulf %39, %43 : vector<16x32xf32>
    %45 = vector.broadcast %25 : vector<1x32xf32> to vector<16x32xf32>
    %46 = arith.mulf %44, %45 : vector<16x32xf32>
    %47 = vector.broadcast %26 : vector<1x32xf32> to vector<16x32xf32>
    %48 = arith.addf %46, %47 : vector<16x32xf32>
    %c256 = arith.constant 256 : index
    %c0_21 = arith.constant 0 : index
    %49 = vector.load %arg2[%c256, %c0_21] : memref<608x128xbf16, #tpu.memory_space<vmem>>, vector<32x96xbf16>
    %50 = arith.truncf %48 : vector<16x32xf32> to vector<16x32xbf16>
    %cst_22 = arith.constant dense<0.000000e+00> : vector<16x96xf32>
    %51 = tpu.matmul %50, %49, %cst_22 {dimension_numbers = #tpu.dot_dimension_numbers<[1], [0], [0], [1], [0, 0, 1, 1], [], []>} : vector<16x32xbf16>, vector<32x96xbf16>, vector<16x96xf32> -> vector<16x96xf32>
    %52 = arith.truncf %51 : vector<16x96xf32> to vector<16x96xbf16>
    %53 = vector.extract_strided_slice %52 {offsets = [0, 0], sizes = [16, 8], strides = [1, 1]} : vector<16x96xbf16> to vector<16x8xbf16>
    %54 = vector.extract_strided_slice %52 {offsets = [0, 32], sizes = [16, 8], strides = [1, 1]} : vector<16x96xbf16> to vector<16x8xbf16>
    %55 = vector.extract_strided_slice %52 {offsets = [0, 64], sizes = [16, 8], strides = [1, 1]} : vector<16x96xbf16> to vector<16x8xbf16>
    "tpu.trace_start"() <{level = 10 : i32, message = "nd,md->nm"}> : () -> ()
    %cst_23 = arith.constant dense<0.000000e+00> : vector<16x16xf32>
    %56 = tpu.matmul %53, %54, %cst_23 {dimension_numbers = #tpu.dot_dimension_numbers<[1], [1], [0], [0], [0, 0, 1, 0], [], []>} : vector<16x8xbf16>, vector<16x8xbf16>, vector<16x16xf32> -> vector<16x16xf32>
    "tpu.trace_stop"() : () -> ()
    %57 = vector.broadcast %24 : vector<1x16xf32> to vector<16x16xf32>
    %58 = arith.addf %56, %57 : vector<16x16xf32>
    %cst_24 = arith.constant dense<0xFF800000> : vector<16xf32>
    %59 = vector.multi_reduction <maximumf>, %58, %cst_24 [1] : vector<16x16xf32> to vector<16xf32>
    %60 = vector.shape_cast %59 : vector<16xf32> to vector<16x1xf32>
    %61 = vector.broadcast %60 : vector<16x1xf32> to vector<16x16xf32>
    %62 = arith.subf %58, %61 : vector<16x16xf32>
    %63 = math.exp %62 : vector<16x16xf32>
    %cst_25 = arith.constant dense<0.000000e+00> : vector<16xf32>
    %64 = vector.multi_reduction <add>, %63, %cst_25 [1] : vector<16x16xf32> to vector<16xf32>
    %65 = vector.shape_cast %64 : vector<16xf32> to vector<16x1xf32>
    %66 = tpu.reciprocal %65 {approx = true} : vector<16x1xf32> -> vector<16x1xf32>
    %67 = vector.broadcast %66 : vector<16x1xf32> to vector<16x16xf32>
    %68 = arith.mulf %63, %67 : vector<16x16xf32>
    %69 = arith.truncf %68 : vector<16x16xf32> to vector<16x16xbf16>
    %cst_26 = arith.constant dense<0.000000e+00> : vector<16x8xf32>
    %70 = tpu.matmul %69, %55, %cst_26 {dimension_numbers = #tpu.dot_dimension_numbers<[1], [0], [0], [1], [0, 0, 1, 1], [], []>} : vector<16x16xbf16>, vector<16x8xbf16>, vector<16x8xf32> -> vector<16x8xf32>
    %71 = vector.extract_strided_slice %52 {offsets = [0, 8], sizes = [16, 8], strides = [1, 1]} : vector<16x96xbf16> to vector<16x8xbf16>
    %72 = vector.extract_strided_slice %52 {offsets = [0, 40], sizes = [16, 8], strides = [1, 1]} : vector<16x96xbf16> to vector<16x8xbf16>
    %73 = vector.extract_strided_slice %52 {offsets = [0, 72], sizes = [16, 8], strides = [1, 1]} : vector<16x96xbf16> to vector<16x8xbf16>
    "tpu.trace_start"() <{level = 10 : i32, message = "nd,md->nm"}> : () -> ()
    %cst_27 = arith.constant dense<0.000000e+00> : vector<16x16xf32>
    %74 = tpu.matmul %71, %72, %cst_27 {dimension_numbers = #tpu.dot_dimension_numbers<[1], [1], [0], [0], [0, 0, 1, 0], [], []>} : vector<16x8xbf16>, vector<16x8xbf16>, vector<16x16xf32> -> vector<16x16xf32>
    "tpu.trace_stop"() : () -> ()
    %75 = vector.broadcast %24 : vector<1x16xf32> to vector<16x16xf32>
    %76 = arith.addf %74, %75 : vector<16x16xf32>
    %cst_28 = arith.constant dense<0xFF800000> : vector<16xf32>
    %77 = vector.multi_reduction <maximumf>, %76, %cst_28 [1] : vector<16x16xf32> to vector<16xf32>
    %78 = vector.shape_cast %77 : vector<16xf32> to vector<16x1xf32>
    %79 = vector.broadcast %78 : vector<16x1xf32> to vector<16x16xf32>
    %80 = arith.subf %76, %79 : vector<16x16xf32>
    %81 = math.exp %80 : vector<16x16xf32>
    %cst_29 = arith.constant dense<0.000000e+00> : vector<16xf32>
    %82 = vector.multi_reduction <add>, %81, %cst_29 [1] : vector<16x16xf32> to vector<16xf32>
    %83 = vector.shape_cast %82 : vector<16xf32> to vector<16x1xf32>
    %84 = tpu.reciprocal %83 {approx = true} : vector<16x1xf32> -> vector<16x1xf32>
    %85 = vector.broadcast %84 : vector<16x1xf32> to vector<16x16xf32>
    %86 = arith.mulf %81, %85 : vector<16x16xf32>
    %87 = arith.truncf %86 : vector<16x16xf32> to vector<16x16xbf16>
    %cst_30 = arith.constant dense<0.000000e+00> : vector<16x8xf32>
    %88 = tpu.matmul %87, %73, %cst_30 {dimension_numbers = #tpu.dot_dimension_numbers<[1], [0], [0], [1], [0, 0, 1, 1], [], []>} : vector<16x16xbf16>, vector<16x8xbf16>, vector<16x8xf32> -> vector<16x8xf32>
    %89 = vector.extract_strided_slice %52 {offsets = [0, 16], sizes = [16, 8], strides = [1, 1]} : vector<16x96xbf16> to vector<16x8xbf16>
    %90 = vector.extract_strided_slice %52 {offsets = [0, 48], sizes = [16, 8], strides = [1, 1]} : vector<16x96xbf16> to vector<16x8xbf16>
    %91 = vector.extract_strided_slice %52 {offsets = [0, 80], sizes = [16, 8], strides = [1, 1]} : vector<16x96xbf16> to vector<16x8xbf16>
    "tpu.trace_start"() <{level = 10 : i32, message = "nd,md->nm"}> : () -> ()
    %cst_31 = arith.constant dense<0.000000e+00> : vector<16x16xf32>
    %92 = tpu.matmul %89, %90, %cst_31 {dimension_numbers = #tpu.dot_dimension_numbers<[1], [1], [0], [0], [0, 0, 1, 0], [], []>} : vector<16x8xbf16>, vector<16x8xbf16>, vector<16x16xf32> -> vector<16x16xf32>
    "tpu.trace_stop"() : () -> ()
    %93 = vector.broadcast %24 : vector<1x16xf32> to vector<16x16xf32>
    %94 = arith.addf %92, %93 : vector<16x16xf32>
    %cst_32 = arith.constant dense<0xFF800000> : vector<16xf32>
    %95 = vector.multi_reduction <maximumf>, %94, %cst_32 [1] : vector<16x16xf32> to vector<16xf32>
    %96 = vector.shape_cast %95 : vector<16xf32> to vector<16x1xf32>
    %97 = vector.broadcast %96 : vector<16x1xf32> to vector<16x16xf32>
    %98 = arith.subf %94, %97 : vector<16x16xf32>
    %99 = math.exp %98 : vector<16x16xf32>
    %cst_33 = arith.constant dense<0.000000e+00> : vector<16xf32>
    %100 = vector.multi_reduction <add>, %99, %cst_33 [1] : vector<16x16xf32> to vector<16xf32>
    %101 = vector.shape_cast %100 : vector<16xf32> to vector<16x1xf32>
    %102 = tpu.reciprocal %101 {approx = true} : vector<16x1xf32> -> vector<16x1xf32>
    %103 = vector.broadcast %102 : vector<16x1xf32> to vector<16x16xf32>
    %104 = arith.mulf %99, %103 : vector<16x16xf32>
    %105 = arith.truncf %104 : vector<16x16xf32> to vector<16x16xbf16>
    %cst_34 = arith.constant dense<0.000000e+00> : vector<16x8xf32>
    %106 = tpu.matmul %105, %91, %cst_34 {dimension_numbers = #tpu.dot_dimension_numbers<[1], [0], [0], [1], [0, 0, 1, 1], [], []>} : vector<16x16xbf16>, vector<16x8xbf16>, vector<16x8xf32> -> vector<16x8xf32>
    %107 = vector.extract_strided_slice %52 {offsets = [0, 24], sizes = [16, 8], strides = [1, 1]} : vector<16x96xbf16> to vector<16x8xbf16>
    %108 = vector.extract_strided_slice %52 {offsets = [0, 56], sizes = [16, 8], strides = [1, 1]} : vector<16x96xbf16> to vector<16x8xbf16>
    %109 = vector.extract_strided_slice %52 {offsets = [0, 88], sizes = [16, 8], strides = [1, 1]} : vector<16x96xbf16> to vector<16x8xbf16>
    "tpu.trace_start"() <{level = 10 : i32, message = "nd,md->nm"}> : () -> ()
    %cst_35 = arith.constant dense<0.000000e+00> : vector<16x16xf32>
    %110 = tpu.matmul %107, %108, %cst_35 {dimension_numbers = #tpu.dot_dimension_numbers<[1], [1], [0], [0], [0, 0, 1, 0], [], []>} : vector<16x8xbf16>, vector<16x8xbf16>, vector<16x16xf32> -> vector<16x16xf32>
    "tpu.trace_stop"() : () -> ()
    %111 = vector.broadcast %24 : vector<1x16xf32> to vector<16x16xf32>
    %112 = arith.addf %110, %111 : vector<16x16xf32>
    %cst_36 = arith.constant dense<0xFF800000> : vector<16xf32>
    %113 = vector.multi_reduction <maximumf>, %112, %cst_36 [1] : vector<16x16xf32> to vector<16xf32>
    %114 = vector.shape_cast %113 : vector<16xf32> to vector<16x1xf32>
    %115 = vector.broadcast %114 : vector<16x1xf32> to vector<16x16xf32>
    %116 = arith.subf %112, %115 : vector<16x16xf32>
    %117 = math.exp %116 : vector<16x16xf32>
    %cst_37 = arith.constant dense<0.000000e+00> : vector<16xf32>
    %118 = vector.multi_reduction <add>, %117, %cst_37 [1] : vector<16x16xf32> to vector<16xf32>
    %119 = vector.shape_cast %118 : vector<16xf32> to vector<16x1xf32>
    %120 = tpu.reciprocal %119 {approx = true} : vector<16x1xf32> -> vector<16x1xf32>
    %121 = vector.broadcast %120 : vector<16x1xf32> to vector<16x16xf32>
    %122 = arith.mulf %117, %121 : vector<16x16xf32>
    %123 = arith.truncf %122 : vector<16x16xf32> to vector<16x16xbf16>
    %cst_38 = arith.constant dense<0.000000e+00> : vector<16x8xf32>
    %124 = tpu.matmul %123, %109, %cst_38 {dimension_numbers = #tpu.dot_dimension_numbers<[1], [0], [0], [1], [0, 0, 1, 1], [], []>} : vector<16x16xbf16>, vector<16x8xbf16>, vector<16x8xf32> -> vector<16x8xf32>
    %125 = tpu.concatenate %70, %88, %106, %124 in 1 : vector<16x8xf32>, vector<16x8xf32>, vector<16x8xf32>, vector<16x8xf32> -> vector<16x32xf32>
    %c288 = arith.constant 288 : index
    %c0_39 = arith.constant 0 : index
    %126 = vector.load %arg2[%c288, %c0_39] : memref<608x128xbf16, #tpu.memory_space<vmem>>, vector<32x32xbf16>
    %127 = arith.truncf %125 : vector<16x32xf32> to vector<16x32xbf16>
    %cst_40 = arith.constant dense<0.000000e+00> : vector<16x32xf32>
    %128 = tpu.matmul %127, %126, %cst_40 {dimension_numbers = #tpu.dot_dimension_numbers<[1], [0], [0], [1], [0, 0, 1, 1], [], []>} : vector<16x32xbf16>, vector<32x32xbf16>, vector<16x32xf32> -> vector<16x32xf32>
    %129 = arith.addf %18, %128 : vector<16x32xf32>
    %c21 = arith.constant 21 : index
    %c0_41 = arith.constant 0 : index
    %130 = vector.load %arg3[%c21, %c0_41] : memref<40x128xf32, #tpu.memory_space<vmem>>, vector<1x32xf32>
    %131 = vector.broadcast %130 : vector<1x32xf32> to vector<16x32xf32>
    %132 = arith.addf %129, %131 : vector<16x32xf32>
    %c22 = arith.constant 22 : index
    %c0_42 = arith.constant 0 : index
    %133 = vector.load %arg3[%c22, %c0_42] : memref<40x128xf32, #tpu.memory_space<vmem>>, vector<1x32xf32>
    %c23 = arith.constant 23 : index
    %c0_43 = arith.constant 0 : index
    %134 = vector.load %arg3[%c23, %c0_43] : memref<40x128xf32, #tpu.memory_space<vmem>>, vector<1x32xf32>
    %cst_44 = arith.constant dense<0.000000e+00> : vector<16xf32>
    %135 = vector.multi_reduction <add>, %132, %cst_44 [1] : vector<16x32xf32> to vector<16xf32>
    %136 = vector.shape_cast %135 : vector<16xf32> to vector<16x1xf32>
    %cst_45 = arith.constant 3.200000e+01 : f32
    %137 = vector.broadcast %cst_45 : f32 to vector<16x1xf32>
    %138 = arith.divf %136, %137 : vector<16x1xf32>
    %139 = vector.broadcast %138 : vector<16x1xf32> to vector<16x32xf32>
    %140 = arith.subf %132, %139 : vector<16x32xf32>
    %141 = arith.mulf %140, %140 : vector<16x32xf32>
    %cst_46 = arith.constant dense<0.000000e+00> : vector<16xf32>
    %142 = vector.multi_reduction <add>, %141, %cst_46 [1] : vector<16x32xf32> to vector<16xf32>
    %143 = vector.shape_cast %142 : vector<16xf32> to vector<16x1xf32>
    %cst_47 = arith.constant 3.200000e+01 : f32
    %144 = vector.broadcast %cst_47 : f32 to vector<16x1xf32>
    %145 = arith.divf %143, %144 : vector<16x1xf32>
    %146 = vector.broadcast %138 : vector<16x1xf32> to vector<16x32xf32>
    %147 = arith.subf %132, %146 : vector<16x32xf32>
    %cst_48 = arith.constant 9.99999974E-6 : f32
    %148 = vector.broadcast %cst_48 : f32 to vector<16x1xf32>
    %149 = arith.addf %145, %148 : vector<16x1xf32>
    %150 = math.rsqrt %149 : vector<16x1xf32>
    %151 = vector.broadcast %150 : vector<16x1xf32> to vector<16x32xf32>
    %152 = arith.mulf %147, %151 : vector<16x32xf32>
    %153 = vector.broadcast %133 : vector<1x32xf32> to vector<16x32xf32>
    %154 = arith.mulf %152, %153 : vector<16x32xf32>
    %155 = vector.broadcast %134 : vector<1x32xf32> to vector<16x32xf32>
    %156 = arith.addf %154, %155 : vector<16x32xf32>
    %c320 = arith.constant 320 : index
    %c0_49 = arith.constant 0 : index
    %157 = vector.load %arg2[%c320, %c0_49] : memref<608x128xbf16, #tpu.memory_space<vmem>>, vector<32x64xbf16>
    %158 = arith.truncf %156 : vector<16x32xf32> to vector<16x32xbf16>
    %cst_50 = arith.constant dense<0.000000e+00> : vector<16x64xf32>
    %159 = tpu.matmul %158, %157, %cst_50 {dimension_numbers = #tpu.dot_dimension_numbers<[1], [0], [0], [1], [0, 0, 1, 1], [], []>} : vector<16x32xbf16>, vector<32x64xbf16>, vector<16x64xf32> -> vector<16x64xf32>
    %c24 = arith.constant 24 : index
    %c0_51 = arith.constant 0 : index
    %160 = vector.load %arg3[%c24, %c0_51] : memref<40x128xf32, #tpu.memory_space<vmem>>, vector<1x64xf32>
    %161 = vector.broadcast %160 : vector<1x64xf32> to vector<16x64xf32>
    %162 = arith.addf %159, %161 : vector<16x64xf32>
    %cst_52 = arith.constant 5.000000e-01 : f32
    %163 = vector.broadcast %cst_52 : f32 to vector<16x64xf32>
    %164 = arith.mulf %163, %162 : vector<16x64xf32>
    %cst_53 = arith.constant 0.707106769 : f32
    %165 = vector.broadcast %cst_53 : f32 to vector<16x64xf32>
    %166 = arith.mulf %162, %165 : vector<16x64xf32>
    %167 = math.erf %166 : vector<16x64xf32>
    %cst_54 = arith.constant 1.000000e+00 : f32
    %168 = vector.broadcast %cst_54 : f32 to vector<16x64xf32>
    %169 = arith.addf %168, %167 : vector<16x64xf32>
    %170 = arith.mulf %164, %169 : vector<16x64xf32>
    %c352 = arith.constant 352 : index
    %c0_55 = arith.constant 0 : index
    %171 = vector.load %arg2[%c352, %c0_55] : memref<608x128xbf16, #tpu.memory_space<vmem>>, vector<64x32xbf16>
    %172 = arith.truncf %170 : vector<16x64xf32> to vector<16x64xbf16>
    %cst_56 = arith.constant dense<0.000000e+00> : vector<16x32xf32>
    %173 = tpu.matmul %172, %171, %cst_56 {dimension_numbers = #tpu.dot_dimension_numbers<[1], [0], [0], [1], [0, 0, 1, 1], [], []>} : vector<16x64xbf16>, vector<64x32xbf16>, vector<16x32xf32> -> vector<16x32xf32>
    %174 = arith.addf %132, %173 : vector<16x32xf32>
    %c25 = arith.constant 25 : index
    %c0_57 = arith.constant 0 : index
    %175 = vector.load %arg3[%c25, %c0_57] : memref<40x128xf32, #tpu.memory_space<vmem>>, vector<1x32xf32>
    %176 = vector.broadcast %175 : vector<1x32xf32> to vector<16x32xf32>
    %177 = arith.addf %174, %176 : vector<16x32xf32>
    %c26 = arith.constant 26 : index
    %c0_58 = arith.constant 0 : index
    %178 = vector.load %arg3[%c26, %c0_58] : memref<40x128xf32, #tpu.memory_space<vmem>>, vector<1x32xf32>
    %c27 = arith.constant 27 : index
    %c0_59 = arith.constant 0 : index
    %179 = vector.load %arg3[%c27, %c0_59] : memref<40x128xf32, #tpu.memory_space<vmem>>, vector<1x32xf32>
    %cst_60 = arith.constant dense<0.000000e+00> : vector<16xf32>
    %180 = vector.multi_reduction <add>, %177, %cst_60 [1] : vector<16x32xf32> to vector<16xf32>
    %181 = vector.shape_cast %180 : vector<16xf32> to vector<16x1xf32>
    %cst_61 = arith.constant 3.200000e+01 : f32
    %182 = vector.broadcast %cst_61 : f32 to vector<16x1xf32>
    %183 = arith.divf %181, %182 : vector<16x1xf32>
    %184 = vector.broadcast %183 : vector<16x1xf32> to vector<16x32xf32>
    %185 = arith.subf %177, %184 : vector<16x32xf32>
    %186 = arith.mulf %185, %185 : vector<16x32xf32>
    %cst_62 = arith.constant dense<0.000000e+00> : vector<16xf32>
    %187 = vector.multi_reduction <add>, %186, %cst_62 [1] : vector<16x32xf32> to vector<16xf32>
    %188 = vector.shape_cast %187 : vector<16xf32> to vector<16x1xf32>
    %cst_63 = arith.constant 3.200000e+01 : f32
    %189 = vector.broadcast %cst_63 : f32 to vector<16x1xf32>
    %190 = arith.divf %188, %189 : vector<16x1xf32>
    %191 = vector.broadcast %183 : vector<16x1xf32> to vector<16x32xf32>
    %192 = arith.subf %177, %191 : vector<16x32xf32>
    %cst_64 = arith.constant 9.99999974E-6 : f32
    %193 = vector.broadcast %cst_64 : f32 to vector<16x1xf32>
    %194 = arith.addf %190, %193 : vector<16x1xf32>
    %195 = math.rsqrt %194 : vector<16x1xf32>
    %196 = vector.broadcast %195 : vector<16x1xf32> to vector<16x32xf32>
    %197 = arith.mulf %192, %196 : vector<16x32xf32>
    %198 = vector.broadcast %178 : vector<1x32xf32> to vector<16x32xf32>
    %199 = arith.mulf %197, %198 : vector<16x32xf32>
    %200 = vector.broadcast %179 : vector<1x32xf32> to vector<16x32xf32>
    %201 = arith.addf %199, %200 : vector<16x32xf32>
    %c416 = arith.constant 416 : index
    %c0_65 = arith.constant 0 : index
    %202 = vector.load %arg2[%c416, %c0_65] : memref<608x128xbf16, #tpu.memory_space<vmem>>, vector<32x96xbf16>
    %203 = arith.truncf %201 : vector<16x32xf32> to vector<16x32xbf16>
    %cst_66 = arith.constant dense<0.000000e+00> : vector<16x96xf32>
    %204 = tpu.matmul %203, %202, %cst_66 {dimension_numbers = #tpu.dot_dimension_numbers<[1], [0], [0], [1], [0, 0, 1, 1], [], []>} : vector<16x32xbf16>, vector<32x96xbf16>, vector<16x96xf32> -> vector<16x96xf32>
    %205 = arith.truncf %204 : vector<16x96xf32> to vector<16x96xbf16>
    %206 = vector.extract_strided_slice %205 {offsets = [0, 0], sizes = [16, 8], strides = [1, 1]} : vector<16x96xbf16> to vector<16x8xbf16>
    %207 = vector.extract_strided_slice %205 {offsets = [0, 32], sizes = [16, 8], strides = [1, 1]} : vector<16x96xbf16> to vector<16x8xbf16>
    %208 = vector.extract_strided_slice %205 {offsets = [0, 64], sizes = [16, 8], strides = [1, 1]} : vector<16x96xbf16> to vector<16x8xbf16>
    "tpu.trace_start"() <{level = 10 : i32, message = "nd,md->nm"}> : () -> ()
    %cst_67 = arith.constant dense<0.000000e+00> : vector<16x16xf32>
    %209 = tpu.matmul %206, %207, %cst_67 {dimension_numbers = #tpu.dot_dimension_numbers<[1], [1], [0], [0], [0, 0, 1, 0], [], []>} : vector<16x8xbf16>, vector<16x8xbf16>, vector<16x16xf32> -> vector<16x16xf32>
    "tpu.trace_stop"() : () -> ()
    %210 = vector.broadcast %24 : vector<1x16xf32> to vector<16x16xf32>
    %211 = arith.addf %209, %210 : vector<16x16xf32>
    %cst_68 = arith.constant dense<0xFF800000> : vector<16xf32>
    %212 = vector.multi_reduction <maximumf>, %211, %cst_68 [1] : vector<16x16xf32> to vector<16xf32>
    %213 = vector.shape_cast %212 : vector<16xf32> to vector<16x1xf32>
    %214 = vector.broadcast %213 : vector<16x1xf32> to vector<16x16xf32>
    %215 = arith.subf %211, %214 : vector<16x16xf32>
    %216 = math.exp %215 : vector<16x16xf32>
    %cst_69 = arith.constant dense<0.000000e+00> : vector<16xf32>
    %217 = vector.multi_reduction <add>, %216, %cst_69 [1] : vector<16x16xf32> to vector<16xf32>
    %218 = vector.shape_cast %217 : vector<16xf32> to vector<16x1xf32>
    %219 = tpu.reciprocal %218 {approx = true} : vector<16x1xf32> -> vector<16x1xf32>
    %220 = vector.broadcast %219 : vector<16x1xf32> to vector<16x16xf32>
    %221 = arith.mulf %216, %220 : vector<16x16xf32>
    %222 = arith.truncf %221 : vector<16x16xf32> to vector<16x16xbf16>
    %cst_70 = arith.constant dense<0.000000e+00> : vector<16x8xf32>
    %223 = tpu.matmul %222, %208, %cst_70 {dimension_numbers = #tpu.dot_dimension_numbers<[1], [0], [0], [1], [0, 0, 1, 1], [], []>} : vector<16x16xbf16>, vector<16x8xbf16>, vector<16x8xf32> -> vector<16x8xf32>
    %224 = vector.extract_strided_slice %205 {offsets = [0, 8], sizes = [16, 8], strides = [1, 1]} : vector<16x96xbf16> to vector<16x8xbf16>
    %225 = vector.extract_strided_slice %205 {offsets = [0, 40], sizes = [16, 8], strides = [1, 1]} : vector<16x96xbf16> to vector<16x8xbf16>
    %226 = vector.extract_strided_slice %205 {offsets = [0, 72], sizes = [16, 8], strides = [1, 1]} : vector<16x96xbf16> to vector<16x8xbf16>
    "tpu.trace_start"() <{level = 10 : i32, message = "nd,md->nm"}> : () -> ()
    %cst_71 = arith.constant dense<0.000000e+00> : vector<16x16xf32>
    %227 = tpu.matmul %224, %225, %cst_71 {dimension_numbers = #tpu.dot_dimension_numbers<[1], [1], [0], [0], [0, 0, 1, 0], [], []>} : vector<16x8xbf16>, vector<16x8xbf16>, vector<16x16xf32> -> vector<16x16xf32>
    "tpu.trace_stop"() : () -> ()
    %228 = vector.broadcast %24 : vector<1x16xf32> to vector<16x16xf32>
    %229 = arith.addf %227, %228 : vector<16x16xf32>
    %cst_72 = arith.constant dense<0xFF800000> : vector<16xf32>
    %230 = vector.multi_reduction <maximumf>, %229, %cst_72 [1] : vector<16x16xf32> to vector<16xf32>
    %231 = vector.shape_cast %230 : vector<16xf32> to vector<16x1xf32>
    %232 = vector.broadcast %231 : vector<16x1xf32> to vector<16x16xf32>
    %233 = arith.subf %229, %232 : vector<16x16xf32>
    %234 = math.exp %233 : vector<16x16xf32>
    %cst_73 = arith.constant dense<0.000000e+00> : vector<16xf32>
    %235 = vector.multi_reduction <add>, %234, %cst_73 [1] : vector<16x16xf32> to vector<16xf32>
    %236 = vector.shape_cast %235 : vector<16xf32> to vector<16x1xf32>
    %237 = tpu.reciprocal %236 {approx = true} : vector<16x1xf32> -> vector<16x1xf32>
    %238 = vector.broadcast %237 : vector<16x1xf32> to vector<16x16xf32>
    %239 = arith.mulf %234, %238 : vector<16x16xf32>
    %240 = arith.truncf %239 : vector<16x16xf32> to vector<16x16xbf16>
    %cst_74 = arith.constant dense<0.000000e+00> : vector<16x8xf32>
    %241 = tpu.matmul %240, %226, %cst_74 {dimension_numbers = #tpu.dot_dimension_numbers<[1], [0], [0], [1], [0, 0, 1, 1], [], []>} : vector<16x16xbf16>, vector<16x8xbf16>, vector<16x8xf32> -> vector<16x8xf32>
    %242 = vector.extract_strided_slice %205 {offsets = [0, 16], sizes = [16, 8], strides = [1, 1]} : vector<16x96xbf16> to vector<16x8xbf16>
    %243 = vector.extract_strided_slice %205 {offsets = [0, 48], sizes = [16, 8], strides = [1, 1]} : vector<16x96xbf16> to vector<16x8xbf16>
    %244 = vector.extract_strided_slice %205 {offsets = [0, 80], sizes = [16, 8], strides = [1, 1]} : vector<16x96xbf16> to vector<16x8xbf16>
    "tpu.trace_start"() <{level = 10 : i32, message = "nd,md->nm"}> : () -> ()
    %cst_75 = arith.constant dense<0.000000e+00> : vector<16x16xf32>
    %245 = tpu.matmul %242, %243, %cst_75 {dimension_numbers = #tpu.dot_dimension_numbers<[1], [1], [0], [0], [0, 0, 1, 0], [], []>} : vector<16x8xbf16>, vector<16x8xbf16>, vector<16x16xf32> -> vector<16x16xf32>
    "tpu.trace_stop"() : () -> ()
    %246 = vector.broadcast %24 : vector<1x16xf32> to vector<16x16xf32>
    %247 = arith.addf %245, %246 : vector<16x16xf32>
    %cst_76 = arith.constant dense<0xFF800000> : vector<16xf32>
    %248 = vector.multi_reduction <maximumf>, %247, %cst_76 [1] : vector<16x16xf32> to vector<16xf32>
    %249 = vector.shape_cast %248 : vector<16xf32> to vector<16x1xf32>
    %250 = vector.broadcast %249 : vector<16x1xf32> to vector<16x16xf32>
    %251 = arith.subf %247, %250 : vector<16x16xf32>
    %252 = math.exp %251 : vector<16x16xf32>
    %cst_77 = arith.constant dense<0.000000e+00> : vector<16xf32>
    %253 = vector.multi_reduction <add>, %252, %cst_77 [1] : vector<16x16xf32> to vector<16xf32>
    %254 = vector.shape_cast %253 : vector<16xf32> to vector<16x1xf32>
    %255 = tpu.reciprocal %254 {approx = true} : vector<16x1xf32> -> vector<16x1xf32>
    %256 = vector.broadcast %255 : vector<16x1xf32> to vector<16x16xf32>
    %257 = arith.mulf %252, %256 : vector<16x16xf32>
    %258 = arith.truncf %257 : vector<16x16xf32> to vector<16x16xbf16>
    %cst_78 = arith.constant dense<0.000000e+00> : vector<16x8xf32>
    %259 = tpu.matmul %258, %244, %cst_78 {dimension_numbers = #tpu.dot_dimension_numbers<[1], [0], [0], [1], [0, 0, 1, 1], [], []>} : vector<16x16xbf16>, vector<16x8xbf16>, vector<16x8xf32> -> vector<16x8xf32>
    %260 = vector.extract_strided_slice %205 {offsets = [0, 24], sizes = [16, 8], strides = [1, 1]} : vector<16x96xbf16> to vector<16x8xbf16>
    %261 = vector.extract_strided_slice %205 {offsets = [0, 56], sizes = [16, 8], strides = [1, 1]} : vector<16x96xbf16> to vector<16x8xbf16>
    %262 = vector.extract_strided_slice %205 {offsets = [0, 88], sizes = [16, 8], strides = [1, 1]} : vector<16x96xbf16> to vector<16x8xbf16>
    "tpu.trace_start"() <{level = 10 : i32, message = "nd,md->nm"}> : () -> ()
    %cst_79 = arith.constant dense<0.000000e+00> : vector<16x16xf32>
    %263 = tpu.matmul %260, %261, %cst_79 {dimension_numbers = #tpu.dot_dimension_numbers<[1], [1], [0], [0], [0, 0, 1, 0], [], []>} : vector<16x8xbf16>, vector<16x8xbf16>, vector<16x16xf32> -> vector<16x16xf32>
    "tpu.trace_stop"() : () -> ()
    %264 = vector.broadcast %24 : vector<1x16xf32> to vector<16x16xf32>
    %265 = arith.addf %263, %264 : vector<16x16xf32>
    %cst_80 = arith.constant dense<0xFF800000> : vector<16xf32>
    %266 = vector.multi_reduction <maximumf>, %265, %cst_80 [1] : vector<16x16xf32> to vector<16xf32>
    %267 = vector.shape_cast %266 : vector<16xf32> to vector<16x1xf32>
    %268 = vector.broadcast %267 : vector<16x1xf32> to vector<16x16xf32>
    %269 = arith.subf %265, %268 : vector<16x16xf32>
    %270 = math.exp %269 : vector<16x16xf32>
    %cst_81 = arith.constant dense<0.000000e+00> : vector<16xf32>
    %271 = vector.multi_reduction <add>, %270, %cst_81 [1] : vector<16x16xf32> to vector<16xf32>
    %272 = vector.shape_cast %271 : vector<16xf32> to vector<16x1xf32>
    %273 = tpu.reciprocal %272 {approx = true} : vector<16x1xf32> -> vector<16x1xf32>
    %274 = vector.broadcast %273 : vector<16x1xf32> to vector<16x16xf32>
    %275 = arith.mulf %270, %274 : vector<16x16xf32>
    %276 = arith.truncf %275 : vector<16x16xf32> to vector<16x16xbf16>
    %cst_82 = arith.constant dense<0.000000e+00> : vector<16x8xf32>
    %277 = tpu.matmul %276, %262, %cst_82 {dimension_numbers = #tpu.dot_dimension_numbers<[1], [0], [0], [1], [0, 0, 1, 1], [], []>} : vector<16x16xbf16>, vector<16x8xbf16>, vector<16x8xf32> -> vector<16x8xf32>
    %278 = tpu.concatenate %223, %241, %259, %277 in 1 : vector<16x8xf32>, vector<16x8xf32>, vector<16x8xf32>, vector<16x8xf32> -> vector<16x32xf32>
    %c448 = arith.constant 448 : index
    %c0_83 = arith.constant 0 : index
    %279 = vector.load %arg2[%c448, %c0_83] : memref<608x128xbf16, #tpu.memory_space<vmem>>, vector<32x32xbf16>
    %280 = arith.truncf %278 : vector<16x32xf32> to vector<16x32xbf16>
    %cst_84 = arith.constant dense<0.000000e+00> : vector<16x32xf32>
    %281 = tpu.matmul %280, %279, %cst_84 {dimension_numbers = #tpu.dot_dimension_numbers<[1], [0], [0], [1], [0, 0, 1, 1], [], []>} : vector<16x32xbf16>, vector<32x32xbf16>, vector<16x32xf32> -> vector<16x32xf32>
    %282 = arith.addf %177, %281 : vector<16x32xf32>
    %c28 = arith.constant 28 : index
    %c0_85 = arith.constant 0 : index
    %283 = vector.load %arg3[%c28, %c0_85] : memref<40x128xf32, #tpu.memory_space<vmem>>, vector<1x32xf32>
    %284 = vector.broadcast %283 : vector<1x32xf32> to vector<16x32xf32>
    %285 = arith.addf %282, %284 : vector<16x32xf32>
    %c29 = arith.constant 29 : index
    %c0_86 = arith.constant 0 : index
    %286 = vector.load %arg3[%c29, %c0_86] : memref<40x128xf32, #tpu.memory_space<vmem>>, vector<1x32xf32>
    %c30 = arith.constant 30 : index
    %c0_87 = arith.constant 0 : index
    %287 = vector.load %arg3[%c30, %c0_87] : memref<40x128xf32, #tpu.memory_space<vmem>>, vector<1x32xf32>
    %cst_88 = arith.constant dense<0.000000e+00> : vector<16xf32>
    %288 = vector.multi_reduction <add>, %285, %cst_88 [1] : vector<16x32xf32> to vector<16xf32>
    %289 = vector.shape_cast %288 : vector<16xf32> to vector<16x1xf32>
    %cst_89 = arith.constant 3.200000e+01 : f32
    %290 = vector.broadcast %cst_89 : f32 to vector<16x1xf32>
    %291 = arith.divf %289, %290 : vector<16x1xf32>
    %292 = vector.broadcast %291 : vector<16x1xf32> to vector<16x32xf32>
    %293 = arith.subf %285, %292 : vector<16x32xf32>
    %294 = arith.mulf %293, %293 : vector<16x32xf32>
    %cst_90 = arith.constant dense<0.000000e+00> : vector<16xf32>
    %295 = vector.multi_reduction <add>, %294, %cst_90 [1] : vector<16x32xf32> to vector<16xf32>
    %296 = vector.shape_cast %295 : vector<16xf32> to vector<16x1xf32>
    %cst_91 = arith.constant 3.200000e+01 : f32
    %297 = vector.broadcast %cst_91 : f32 to vector<16x1xf32>
    %298 = arith.divf %296, %297 : vector<16x1xf32>
    %299 = vector.broadcast %291 : vector<16x1xf32> to vector<16x32xf32>
    %300 = arith.subf %285, %299 : vector<16x32xf32>
    %cst_92 = arith.constant 9.99999974E-6 : f32
    %301 = vector.broadcast %cst_92 : f32 to vector<16x1xf32>
    %302 = arith.addf %298, %301 : vector<16x1xf32>
    %303 = math.rsqrt %302 : vector<16x1xf32>
    %304 = vector.broadcast %303 : vector<16x1xf32> to vector<16x32xf32>
    %305 = arith.mulf %300, %304 : vector<16x32xf32>
    %306 = vector.broadcast %286 : vector<1x32xf32> to vector<16x32xf32>
    %307 = arith.mulf %305, %306 : vector<16x32xf32>
    %308 = vector.broadcast %287 : vector<1x32xf32> to vector<16x32xf32>
    %309 = arith.addf %307, %308 : vector<16x32xf32>
    %c480 = arith.constant 480 : index
    %c0_93 = arith.constant 0 : index
    %310 = vector.load %arg2[%c480, %c0_93] : memref<608x128xbf16, #tpu.memory_space<vmem>>, vector<32x64xbf16>
    %311 = arith.truncf %309 : vector<16x32xf32> to vector<16x32xbf16>
    %cst_94 = arith.constant dense<0.000000e+00> : vector<16x64xf32>
    %312 = tpu.matmul %311, %310, %cst_94 {dimension_numbers = #tpu.dot_dimension_numbers<[1], [0], [0], [1], [0, 0, 1, 1], [], []>} : vector<16x32xbf16>, vector<32x64xbf16>, vector<16x64xf32> -> vector<16x64xf32>
    %c31 = arith.constant 31 : index
    %c0_95 = arith.constant 0 : index
    %313 = vector.load %arg3[%c31, %c0_95] : memref<40x128xf32, #tpu.memory_space<vmem>>, vector<1x64xf32>
    %314 = vector.broadcast %313 : vector<1x64xf32> to vector<16x64xf32>
    %315 = arith.addf %312, %314 : vector<16x64xf32>
    %cst_96 = arith.constant 5.000000e-01 : f32
    %316 = vector.broadcast %cst_96 : f32 to vector<16x64xf32>
    %317 = arith.mulf %316, %315 : vector<16x64xf32>
    %cst_97 = arith.constant 0.707106769 : f32
    %318 = vector.broadcast %cst_97 : f32 to vector<16x64xf32>
    %319 = arith.mulf %315, %318 : vector<16x64xf32>
    %320 = math.erf %319 : vector<16x64xf32>
    %cst_98 = arith.constant 1.000000e+00 : f32
    %321 = vector.broadcast %cst_98 : f32 to vector<16x64xf32>
    %322 = arith.addf %321, %320 : vector<16x64xf32>
    %323 = arith.mulf %317, %322 : vector<16x64xf32>
    %c512 = arith.constant 512 : index
    %c0_99 = arith.constant 0 : index
    %324 = vector.load %arg2[%c512, %c0_99] : memref<608x128xbf16, #tpu.memory_space<vmem>>, vector<64x32xbf16>
    %325 = arith.truncf %323 : vector<16x64xf32> to vector<16x64xbf16>
    %cst_100 = arith.constant dense<0.000000e+00> : vector<16x32xf32>
    %326 = tpu.matmul %325, %324, %cst_100 {dimension_numbers = #tpu.dot_dimension_numbers<[1], [0], [0], [1], [0, 0, 1, 1], [], []>} : vector<16x64xbf16>, vector<64x32xbf16>, vector<16x32xf32> -> vector<16x32xf32>
    %327 = arith.addf %285, %326 : vector<16x32xf32>
    %c32 = arith.constant 32 : index
    %c0_101 = arith.constant 0 : index
    %328 = vector.load %arg3[%c32, %c0_101] : memref<40x128xf32, #tpu.memory_space<vmem>>, vector<1x32xf32>
    %329 = vector.broadcast %328 : vector<1x32xf32> to vector<16x32xf32>
    %330 = arith.addf %327, %329 : vector<16x32xf32>
    %331 = vector.extract_strided_slice %330 {offsets = [0, 0], sizes = [9, 32], strides = [1, 1]} : vector<16x32xf32> to vector<9x32xf32>
    %cst_102 = arith.constant dense<0.000000e+00> : vector<32xf32>
    %332 = vector.multi_reduction <add>, %331, %cst_102 [0] : vector<9x32xf32> to vector<32xf32>
    %333 = vector.shape_cast %332 : vector<32xf32> to vector<1x32xf32>
    %cst_103 = arith.constant 9.000000e+00 : f32
    %334 = vector.broadcast %cst_103 : f32 to vector<1x32xf32>
    %335 = arith.divf %333, %334 : vector<1x32xf32>
    %c33 = arith.constant 33 : index
    %c0_104 = arith.constant 0 : index
    %336 = vector.load %arg3[%c33, %c0_104] : memref<40x128xf32, #tpu.memory_space<vmem>>, vector<1x32xf32>
    %c34 = arith.constant 34 : index
    %c0_105 = arith.constant 0 : index
    %337 = vector.load %arg3[%c34, %c0_105] : memref<40x128xf32, #tpu.memory_space<vmem>>, vector<1x32xf32>
    %cst_106 = arith.constant dense<0.000000e+00> : vector<1xf32>
    %338 = vector.multi_reduction <add>, %335, %cst_106 [1] : vector<1x32xf32> to vector<1xf32>
    %339 = vector.shape_cast %338 : vector<1xf32> to vector<1x1xf32>
    %cst_107 = arith.constant 3.200000e+01 : f32
    %340 = vector.broadcast %cst_107 : f32 to vector<1x1xf32>
    %341 = arith.divf %339, %340 : vector<1x1xf32>
    %342 = vector.broadcast %341 : vector<1x1xf32> to vector<1x32xf32>
    %343 = arith.subf %335, %342 : vector<1x32xf32>
    %344 = arith.mulf %343, %343 : vector<1x32xf32>
    %cst_108 = arith.constant dense<0.000000e+00> : vector<1xf32>
    %345 = vector.multi_reduction <add>, %344, %cst_108 [1] : vector<1x32xf32> to vector<1xf32>
    %346 = vector.shape_cast %345 : vector<1xf32> to vector<1x1xf32>
    %cst_109 = arith.constant 3.200000e+01 : f32
    %347 = vector.broadcast %cst_109 : f32 to vector<1x1xf32>
    %348 = arith.divf %346, %347 : vector<1x1xf32>
    %349 = vector.broadcast %341 : vector<1x1xf32> to vector<1x32xf32>
    %350 = arith.subf %335, %349 : vector<1x32xf32>
    %cst_110 = arith.constant 9.99999974E-6 : f32
    %351 = vector.broadcast %cst_110 : f32 to vector<1x1xf32>
    %352 = arith.addf %348, %351 : vector<1x1xf32>
    %353 = math.rsqrt %352 : vector<1x1xf32>
    %354 = vector.broadcast %353 : vector<1x1xf32> to vector<1x32xf32>
    %355 = arith.mulf %350, %354 : vector<1x32xf32>
    %356 = arith.mulf %355, %336 : vector<1x32xf32>
    %357 = arith.addf %356, %337 : vector<1x32xf32>
    %c576 = arith.constant 576 : index
    %c0_111 = arith.constant 0 : index
    %358 = vector.load %arg2[%c576, %c0_111] : memref<608x128xbf16, #tpu.memory_space<vmem>>, vector<32x128xbf16>
    %359 = arith.truncf %357 : vector<1x32xf32> to vector<1x32xbf16>
    %cst_112 = arith.constant dense<0.000000e+00> : vector<1x128xf32>
    %360 = tpu.matmul %359, %358, %cst_112 {dimension_numbers = #tpu.dot_dimension_numbers<[1], [0], [0], [1], [0, 0, 1, 1], [], []>} : vector<1x32xbf16>, vector<32x128xbf16>, vector<1x128xf32> -> vector<1x128xf32>
    %c35 = arith.constant 35 : index
    %c0_113 = arith.constant 0 : index
    %361 = vector.load %arg3[%c35, %c0_113] : memref<40x128xf32, #tpu.memory_space<vmem>>, vector<1x128xf32>
    %362 = arith.addf %360, %361 : vector<1x128xf32>
    %c0_114 = arith.constant 0 : index
    %c0_115 = arith.constant 0 : index
    %c0_116 = arith.constant 0 : index
    %363 = vector.load %arg4[%c0_114, %c0_115, %c0_116] : memref<1x1x128xf32, #tpu.memory_space<vmem>>, vector<1x1x128xf32>
    %364 = vector.shape_cast %363 : vector<1x1x128xf32> to vector<1x128xf32>
    %365 = vector.shape_cast %362 : vector<1x128xf32> to vector<1x1x128xf32>
    tpu.vector_store %arg4[%c0_114, %c0_115, %c0_116], %365 {strides = array<i32>} : memref<1x1x128xf32, #tpu.memory_space<vmem>>, vector<1x1x128xf32>,
    return
  }
  func.func @transform_0(%arg0: i32) -> (i32, i32, i32) {
    %c0_i32 = arith.constant 0 : i32
    %c0_i32_0 = arith.constant 0 : i32
    %c0_i32_1 = arith.constant 0 : i32
    return %arg0, %c0_i32, %c0_i32_0 : i32, i32, i32
  }
  func.func @transform_1(%arg0: i32) -> (i32, i32) {
    %c0_i32 = arith.constant 0 : i32
    %c0_i32_0 = arith.constant 0 : i32
    %c0_i32_1 = arith.constant 0 : i32
    return %c0_i32, %c0_i32_0 : i32, i32
  }
  func.func @transform_2(%arg0: i32) -> (i32, i32) {
    %c0_i32 = arith.constant 0 : i32
    %c0_i32_0 = arith.constant 0 : i32
    %c0_i32_1 = arith.constant 0 : i32
    return %c0_i32, %c0_i32_0 : i32, i32
  }
  func.func @transform_3(%arg0: i32) -> (i32, i32, i32) {
    %c0_i32 = arith.constant 0 : i32
    %c0_i32_0 = arith.constant 0 : i32
    %c0_i32_1 = arith.constant 0 : i32
    return %arg0, %c0_i32, %c0_i32_0 : i32, i32, i32
  }
}

</mosaic_0001>

<bundles_post_ra>
// kernel: forward.1
= control target key start
LH: loop header
LB: loop body
LE: loop exit
PB: predicated region body
PF: predicated region fallthrough
CT: control target
= control target key end

     0   :  { %8 = vsyncpa [#allocation3], 0  ;;  %s3639_s0 = inlined_call_operand.vmem [shape: f32[2,8,128], index: 0, kind: input, shape index: {}]   ;;  %s3640_s1 = inlined_call_operand.vmem [shape: bf16[608,128], index: 1, kind: input, shape index: {}]   ;;  %s3641_s2 = inlined_call_operand.vmem [shape: f32[40,128], index: 2, kind: input, shape index: {}]   ;;  %s3642_s3 = inlined_call_operand.hbm [shape: f32[2,1,128], index: 3, kind: output, shape index: {}]  }
   0x1   :  { %10 = vsyncpa [#allocation3 + $0x1], 0  ;;  %s3041_s12 = smov 0   ;;  %s3043_s13 = smov 0  }
   0x2   :  { %s3045_s14 = smov 0   ;;  %s3047_s15 = smov 0  }
   0x3 LB: > { %s3062_s16 = sadd.s32 4294967295, %s3001_s15   ;;  %s2341_s17 = sadd.s32 4294967294, %s3001_s15   ;;  %s3001_s15 = sphi %s3047_s15, %s3654_s15   ;;  %s2997_s14 = sphi %s3045_s14, %s3653_s14   ;;  %s2993_s13 = sphi %s3043_s13, %s3652_s13   ;;  %s2989_s12 = sphi %s3041_s12, %s3651_s12  }
   0x4   : > { %s3066_s18 = sadd.s32 1, %s3001_s15   ;;  %s91_s19 = sadd.s32 1, %s2997_s14 }
   0x5   : > { %s88_s20 = ssub.s32 %s3001_s15, %s3066_s18  ;;  %p101_p0 = scmp.ne.s32.totalorder %s2997_s14, %s2993_s13 }
   0x6   : > { %p89_p1 = scmp.eq.s32.totalorder %s88_s20, 0  ;;  %p102_p2 = scmp.eq.s32.totalorder %s3062_s16, 1 }
   0x7   : > { %p107_p3 = scmp.ne.s32.totalorder %s2993_s13, %s2989_s12  ;;  %p108_p4 = scmp.eq.s32.totalorder %s2341_s17, 1 }
   0x8   : > { %s3077_s21 = scalar_select %p89_p1, %s2997_s14, %s91_s19  }
   0x9   : > { %p3079_p5 = por %p102_p2, %p101_p0  ;;  %p3083_p6 = por %p108_p4, %p107_p3 }
   0xa   : > { %p2344_p7 = scmp.ge.s32.totalorder %s3001_s15, 1  ;;  %p139_p8 = scmp.lt.s32.totalorder %s3001_s15, 3 }
   0xc   : > { %p140_p9 = pnand %p2344_p7, %p139_p8 }
   0xd   : > { %v2811_v0 = vld [vmem:[%s3640_s1] sm:$0xff] (!%p140_p9)   ;;  %v3003_v1 = vmov (!%p140_p9), 0.0   ;;  %v2812_v2 = vld [vmem:[%s3640_s1 + $0x8] sm:$0xff] (!%p140_p9)   ;;  %vm3004_vm0 = vmmov (!%p140_p9), 0   ;;  %v2813_v3 = vld [vmem:[%s3640_s1 + $0x10] sm:$0xff] (!%p140_p9)   ;;  %p161_p10 = scmp.lt.s32.totalorder (!%p140_p9), %s3062_s16, 1 }
   0xe   : > { %143 = sbr.rel (%p140_p9) target bundleno = 6129 (0x17f1), region = 32  ;;  %2509 = vmatprep.subr.bf16.mxu0 (!%p140_p9), %v3003_v1  ;;  %2529 = vmatprep.subr.bf16.mxu1 (!%p140_p9), %v3003_v1  ;;  %v2819_v4 = vld [vmem:[%s3640_s1 + $0x40] sm:$0xff] (!%p140_p9)   ;;  %v2814_v5 = vld [vmem:[%s3640_s1 + $0x18] sm:$0xff] (!%p140_p9)   ;;  %v2820_v6 = vld [vmem:[%s3640_s1 + $0x48] sm:$0xff] (!%p140_p9)   ;;  %vm391_vm1 = vcmask (!%p140_p9), 1040384   ;;  %vm404_vm2 = vcmask (!%p140_p9), 261120  }
   0xf   : > { %2510 = vmatpush3.bf16.msra.mxu0 (!%p140_p9), %v2811_v0  ;;  %2525 = vmatprep.mubr.msk.bf16.mxu0 (!%p140_p9), %vm3004_vm0, %v3003_v1  ;;  %v2815_v7 = vld [vmem:[%s3640_s1 + $0x20] sm:$0xff] (!%p140_p9)   ;;  %v2821_v8 = vld [vmem:[%s3640_s1 + $0x50] sm:$0xff] (!%p140_p9)   ;;  %v2816_v9 = vld [vmem:[%s3640_s1 + $0x28] sm:$0xff] (!%p140_p9)   ;;  %s3005_s25 = smov (!%p140_p9), 88   ;;  %s3006_s26 = smov (!%p140_p9), 96   ;;  %vm509_vm3 = vcmask (!%p140_p9), 64512  }
  0x10   : > { %2511 = vmatprep.subr.bf16.mxu0 (!%p140_p9), %v3003_v1  ;;  %2545 = vmatprep.mubr.msk.bf16.mxu1 (!%p140_p9), %vm3004_vm0, %v3003_v1  ;;  %v2822_v10 = vld [vmem:[%s3640_s1 + $0x58] sm:$0xff] (!%p140_p9)   ;;  %v2817_v11 = vld [vmem:[%s3640_s1 + $0x30] sm:$0xff] (!%p140_p9)   ;;  %v2823_v12 = vld [vmem:[%s3640_s1 + $0x60] sm:$0xff] (!%p140_p9)   ;;  %s3007_s27 = smov (!%p140_p9), 120   ;;  %s3008_s28 = smov (!%p140_p9), 112   ;;  %vm557_vm5 = vcmask (!%p140_p9), 130048  }
  0x11   : > { %2530 = vmatpush3.bf16.msra.mxu1 (!%p140_p9), %v2819_v4  ;;  %v2818_v13 = vld [vmem:[%s3640_s1 + $0x38] sm:$0xff] (!%p140_p9)   ;;  %v2824_v15 = vld [vmem:[%s3640_s1 + $0x68] sm:$0xff] (!%p140_p9)   ;;  %v2825_v17 = vld [vmem:[%s3640_s1 + $0x70] sm:$0xff] (!%p140_p9)   ;;  %s3009_s29 = smov (!%p140_p9), 80   ;;  %s3010_s30 = smov (!%p140_p9), 104   ;;  %vm1019_vm6 = vcmask (!%p140_p9), 195584  }
  0x12   : > { %2531 = vmatprep.subr.bf16.mxu1 (!%p140_p9), %v3003_v1  ;;  %v2826_v18 = vld [vmem:[%s3640_s1 + $0x78] sm:$0xff] (!%p140_p9)   ;;  %v2346_v19 = vld [vmem:[%s3641_s2] ss:$0 sm:$0xff] (!%p140_p9)  ;;  %v2355_v26 = vld [vmem:[%s3641_s2 + $0x1] ss:$0 sm:$0xff] (!%p140_p9)  ;;  %s3011_s4 = smov (!%p140_p9), 72  }
  0x13   : > { %2512 = vmatpush3.bf16.msra.mxu0 (!%p140_p9), %v2812_v2  ;;  %v387_v31 = vld [vmem:[%s3641_s2 + $0x2] sm:$0x1] (!%p140_p9)  ;;  %v394_v34 = vld [vmem:[%s3641_s2 + $0x3] sm:$0xff] (!%p140_p9)  ;;  %v395_v36 = vld [vmem:[%s3641_s2 + $0xb] sm:$0xff] (!%p140_p9)  ;;  %s3014_s6 = smov (!%p140_p9), 48   ;;  %s3016_s8 = smov (!%p140_p9), 56  }
  0x14   : > { %2513 = vmatprep.subr.bf16.mxu0 (!%p140_p9), %v3003_v1  ;;  %v2827_v52 = vld [vmem:[%s3640_s1 + $0x80] sm:$0xff] (!%p140_p9)   ;;  %v2828_v53 = vld [vmem:[%s3640_s1 + $0x88] sm:$0xff] (!%p140_p9)   ;;  %v2364_v62 = vld [vmem:[%s3641_s2 + $0x13] ss:$0 sm:$0xff] (!%p140_p9)  ;;  %s3645_s11 = smov (!%p140_p9), 8   ;;  %s3644_s20 = smov (!%p140_p9), 16  }
  0x15   : > { %s162_s7 = scalar_select %p161_p10, %s3062_s16, 1  ;;  %2532 = vmatpush3.bf16.msra.mxu1 %v2820_v6  ;;  %vm1241_vm7 = vcmask 523264   ;;  %vm2183_vm8 = vcmask 253952  }
  0x16   : > { %2533 = vmatprep.subr.bf16.mxu1 %v3003_v1  ;;  %s3643_s24 = smov 24   ;;  %s3020_s10 = smov [#allocation2]  }
  0x17   : > { %2514 = vmatpush3.bf16.msra.mxu0 %v2813_v3  ;;  %s2345_s17 = sshll.u32 %s162_s7, 3  ;;  %v2365_v3 = vld [vmem:[%s3641_s2 + $0x14] ss:$0 sm:$0xff]  ;;  %s3015_s7 = smov 40  }
  0x18   : > { %2515 = vmatprep.subr.bf16.mxu0 %v3003_v1  ;;  %s164_s5 = scalar_lea.vmem %s3639_s0, %s2345_s17 }
  0x19   : > { %2534 = vmatpush3.bf16.msra.mxu1 %v2821_v8  ;;  %v166_v14 = vld [vmem:[%s164_s5] sm:$0xff]  ;;  %s3013_s5 = smov 64  }
  0x1a   : > { %2535 = vmatprep.subr.bf16.mxu1 %v3003_v1  ;;  %v183_v16 = vpack.c.bf16 %v166_v14, %v166_v14 }
  0x1b   : > { %2516 = vmatpush3.bf16.msra.mxu0 %v2814_v5 }
  0x1c   : > { %2517 = vmatprep.subr.bf16.mxu0 %v3003_v1 }
  0x1d   : > { %2536 = vmatpush3.bf16.msra.mxu1 %v2822_v10 }
  0x1e   : > { %2537 = vmatprep.subr.bf16.mxu1 %v3003_v1 }
  0x1f   : > { %2518 = vmatpush3.bf16.msra.mxu0 %v2815_v7 }
  0x20   : > { %2519 = vmatprep.subr.bf16.mxu0 %v3003_v1 }
  0x21   : > { %2538 = vmatpush3.bf16.msra.mxu1 %v2823_v12 }
  0x22   : > { %2539 = vmatprep.subr.bf16.mxu1 %v3003_v1 }
  0x23   : > { %2520 = vmatpush3.bf16.msra.mxu0 %v2816_v9 }
  0x24   : > { %2521 = vmatprep.subr.bf16.mxu0 %v3003_v1 }
  0x25   : > { %2540 = vmatpush3.bf16.msra.mxu1 %v2824_v15 }
  0x26   : > { %2541 = vmatprep.subr.bf16.mxu1 %v3003_v1 }
  0x27   : > { %2522 = vmatpush3.bf16.msra.mxu0 %v2817_v11 }
  0x28   : > { %2523 = vmatprep.subr.bf16.mxu0 %v3003_v1 }
  0x29   : > { %2542 = vmatpush3.bf16.msra.mxu1 %v2825_v17 }
  0x2a   : > { %2543 = vmatprep.subr.bf16.mxu1 %v3003_v1 }
  0x2b   : > { %2524 = vmatpush3.bf16.msra.mxu0 %v2818_v13 }
  0x2c   : > { %2549 = vmatprep.subr.bf16.mxu0 %v3003_v1 }
  0x2d   : > { %2544 = vmatpush3.bf16.msra.mxu1 %v2826_v18 }
  0x2e   : > { %2526 = vmatmul.mubr.bf16.vlgmr.msra.gmra.mrb[0].mxu0 %v183_v16  ;;  %2557 = vmatprep.subr.bf16.mxu1 %v3003_v1 }
  0x2f   : > { %2553 = vmatprep.mubr.msk.bf16.mxu0 %vm3004_vm0, %v3003_v1  ;;  %2550 = vmatpush3.bf16.msra.mxu0 %v2827_v52 }
  0x30   : > { %2551 = vmatprep.subr.bf16.mxu0 %v3003_v1 }
  0x33   : > { %2552 = vmatpush3.bf16.msra.mxu0 %v2828_v53 }
  0x34   : > { %2563 = vmatprep.subr.bf16.mxu0 %v3003_v1 }
 0x101   : > { %v271_v20 = vpop.f32.mrb[0].mxu0 }
 0x102   : > { %v272_v21 = vadd.f32 %v2346_v19, %v271_v20  ;;  %v2527_v22 = vpop.f32.mrb[1].mxu0 }
 0x103   : > { %v274_v23 = vpop.f32.mrb[2].mxu0 }
 0x104   : > { %v293_v24 = vpack.c.bf16 %v272_v21, %v272_v21  ;;  %v2528_v25 = vpop.f32.mrb[3].mxu0 }
 0x106   : > { %2546 = vmatmul.mubr.bf16.vlgmr.msra.gmra.mrb[0].mxu1 %v293_v24  ;;  %v398_v24 = vlaneseq }
 0x107   : > { %2559 = vmatprep.mubr.msk.bf16.mxu1 %vm3004_vm0, %v3003_v1 }
 0x108   : > { %v399_v25 = vand.u32 127, %v398_v24 }
 0x10a   : > { %vm400_vm4 = vcmp.lt.s32.totalorder %v399_v25, 9 }
 0x1d9   : > { %v381_v27 = vpop.f32.mrb[0].mxu1 }
 0x1da   : > { %v382_v28 = vadd.f32 %v2355_v26, %v381_v27  ;;  %v2547_v29 = vpop.f32.mrb[1].mxu1  ;;  %v3012_v26 = vmov -1e+30  }
 0x1db   : > { %v384_v30 = vpop.f32.mrb[2].mxu1  ;;  %v3249_v27 = vsel %vm400_vm4, 0.0, %v3012_v26 }
 0x1dc   : > { %v389_v32 = vrot.slane %v382_v28, 7  ;;  %v2548_v33 = vpop.f32.mrb[3].mxu1 }
 0x1de   : > { %v393_v35 = vsel %vm391_vm1, %v389_v32, 0.0  ;;  %v392_v37 = vsel %vm391_vm1, %v387_v31, %v389_v32 }
 0x1df   : > { %v3183_v38 = vadd.f32 %v394_v34, %v392_v37  ;;  %v3185_v39 = vadd.f32 %v395_v36, %v393_v35 }
 0x1e1   : > { %v405_v40 = vsel %vm404_vm2, %v3183_v38, 0.0  ;;  %v408_v41 = vsel %vm404_vm2, %v3185_v39, 0.0 }
 0x1e2   : > { %406 = vadd.xlane.f32.xlu0 %v405_v40 }
 0x1e6   : > { %409 = vadd.xlane.f32.xlu0 %v408_v41 }
 0x26f   : > { %v407_v42 = vpop.xlane.xlu0 %406 }
 0x270   : > { %v412_v43 = vmul.f32 0.03125, %v407_v42 }
 0x272   : > { %v414_v44 = vsub.f32 %v3183_v38, %v412_v43 }
 0x273   : > { %v410_v45 = vpop.xlane.xlu0 %409 }
 0x274   : > { %v413_v46 = vmul.f32 0.03125, %v410_v45  ;;  %v416_v47 = vmul.f32 %v414_v44, %v414_v44 }
 0x276   : > { %v415_v48 = vsub.f32 %v3185_v39, %v413_v46  ;;  %v418_v49 = vsel %vm404_vm2, %v416_v47, 0.0 }
 0x277   : > { %419 = vadd.xlane.f32.xlu1 %v418_v49 }
 0x278   : > { %v417_v50 = vmul.f32 %v415_v48, %v415_v48 }
 0x27a   : > { %v421_v51 = vsel %vm404_vm2, %v417_v50, 0.0 }
 0x27b   : > { %422 = vadd.xlane.f32.xlu1 %v421_v51 }
 0x304   : > { %v420_v54 = vpop.xlane.xlu1 %419 }
 0x305   : > { %v424_v55 = vmul.f32 0.03125, %v420_v54 }
 0x307   : > { %v426_v56 = vadd.f32 1e-05, %v424_v55 }
 0x308   : > { %v423_v57 = vpop.xlane.xlu1 %422 }
 0x309   : > { %2849 = vrsqrt.f32 %v426_v56  ;;  %v425_v58 = vmul.f32 0.03125, %v423_v57 }
 0x30b   : > { %v427_v59 = vadd.f32 1e-05, %v425_v58 }
 0x30d   : > { %2851 = vrsqrt.f32 %v427_v59 }
 0x313   : > { %v2850_v60 = vpop.eup %2849 }
 0x314   : > { %v430_v61 = vmul.f32 %v2850_v60, %v414_v44 }
 0x316   : > { %v436_v0 = vmul.f32 %v2364_v62, %v430_v61 }
 0x317   : > { %v2852_v63 = vpop.eup %2851 }
 0x318   : > { %v431_v2 = vmul.f32 %v2852_v63, %v415_v48  ;;  %v442_v5 = vadd.f32 %v2365_v3, %v436_v0 }
 0x31a   : > { %v437_v4 = vmul.f32 %v2364_v62, %v431_v2 }
 0x31c   : > { %v443_v6 = vadd.f32 %v2365_v3, %v437_v4 }
 0x31e   : > { %v448_v7 = vpack.c.bf16 %v443_v6, %v442_v5 }
 0x320   : > { %2554 = vmatmul.mubr.msk.bf16.vlgmr.msra.gmra.mrb[4].mxu0 %vm404_vm2, %v448_v7 }
 0x321   : > { %2565 = vmatprep.mubr.msk.bf16.mxu0 %vm3004_vm0, %v3003_v1 }
 0x3f3   : > { %v498_v8 = vpop.f32.mrb[4].mxu0 }
 0x3f4   : > { %v2555_v9 = vpop.f32.mrb[5].mxu0 }
 0x3f5   : > { %v501_v10 = vpop.f32.mrb[6].mxu0 }
 0x3f6   : > { %v3212_v11 = vpack.c.bf16 %v501_v10, %v498_v8  ;;  %v2556_v12 = vpop.f32.mrb[7].mxu0 }
 0x3f8   : > { %630 = vrot.lane.b32.xlu1 %v3212_v11, %s3005_s25  ;;  %507 = vrot.lane.b32.xlu0 %v3212_v11, %s3006_s26 }
 0x3fc   : > { %628 = vrot.lane.b32.xlu1 %v3212_v11, %s3007_s27  ;;  %749 = vrot.lane.b32.xlu0 %v3212_v11, %s3008_s28 }
 0x400   : > { %751 = vrot.lane.b32.xlu1 %v3212_v11, %s3009_s29  ;;  %870 = vrot.lane.b32.xlu0 %v3212_v11, %s3010_s30 }
 0x404   : > { %872 = vrot.lane.b32.xlu1 %v3212_v11, %s3011_s4 }
 0x46a   : > { %v508_v13 = vpop.permute.xlu0 %507  ;;  %v631_v15 = vpop.permute.xlu1 %630 }
 0x46b   : > { %v514_v14 = vsel %vm509_vm3, %v508_v13, 0  ;;  %v636_v17 = vsel %vm509_vm3, %v631_v15, 0 }
 0x46c   : > { %2558 = vmatpush3.bf16.xpose.msra.mxu1 %v514_v14 }
 0x46d   : > { %2569 = vmatprep.subr.bf16.mxu1 %v3003_v1 }
 0x46e   : > { %v629_v16 = vpop.permute.xlu1 %628  ;;  %v750_v21 = vpop.permute.xlu0 %749 }
 0x472   : > { %v752_v18 = vpop.permute.xlu1 %751  ;;  %v871_v23 = vpop.permute.xlu0 %870 }
 0x473   : > { %2560 = vmatmul.mubr.msk.bf16.vlgmr.msra.gmra.mrb[4].mxu1 %vm509_vm3, %v3212_v11  ;;  %v757_v19 = vsel %vm509_vm3, %v752_v18, 0 }
 0x474   : > { %2570 = vmatpush3.bf16.xpose.msra.mxu1 %v636_v17  ;;  %2571 = vmatprep.mubr.msk.bf16.mxu1 %vm3004_vm0, %v3003_v1 }
 0x475   : > { %2581 = vmatprep.subr.bf16.mxu1 %v3003_v1 }
 0x476   : > { %v873_v20 = vpop.permute.xlu1 %872 }
 0x477   : > { %v878_v22 = vsel %vm509_vm3, %v873_v20, 0 }
 0x47b   : > { %2572 = vmatmul.mubr.msk.bf16.vlgmr.msra.gmra.mrb[8].mxu1 %vm509_vm3, %v629_v16 }
 0x47c   : > { %2582 = vmatpush3.bf16.xpose.msra.mxu1 %v757_v19  ;;  %2583 = vmatprep.mubr.msk.bf16.mxu1 %vm3004_vm0, %v3003_v1 }
 0x47d   : > { %2593 = vmatprep.subr.bf16.mxu1 %v3003_v1 }
 0x483   : > { %2584 = vmatmul.mubr.msk.bf16.vlgmr.msra.gmra.mrb[12].mxu1 %vm509_vm3, %v750_v21 }
 0x484   : > { %2594 = vmatpush3.bf16.xpose.msra.mxu1 %v878_v22  ;;  %2595 = vmatprep.mubr.msk.bf16.mxu1 %vm3004_vm0, %v3003_v1 }
 0x485   : > { %2605 = vmatprep.subr.bf16.mxu1 %v3003_v1 }
 0x48b   : > { %2596 = vmatmul.mubr.msk.bf16.vlgmr.msra.gmra.mrb[16].mxu1 %vm509_vm3, %v871_v23 }
 0x48c   : > { %2609 = vmatprep.mubr.msk.bf16.mxu1 %vm3004_vm0, %v3003_v1 }
 0x546   : > { %v550_v28 = vpop.f32.mrb[4].mxu1 }
 0x547   : > { %v551_v29 = vadd.f32 %v550_v28, %v3249_v27  ;;  %v2561_v30 = vpop.f32.mrb[5].mxu1 }
 0x548   : > { %v553_v31 = vpop.f32.mrb[6].mxu1 }
 0x549   : > { %v554_v32 = vadd.f32 %v553_v31, %v3249_v27  ;;  %v2562_v33 = vpop.f32.mrb[7].mxu1  ;;  %v558_v34 = vsel %vm557_vm5, %v551_v29, -inf }
 0x54a   : > { %559 = vmax.xlane.f32.xlu1 %v558_v34 }
 0x54b   : > { %v561_v35 = vsel %vm557_vm5, %v554_v32, -inf }
 0x54c   : > { %562 = vmax.xlane.f32.xlu0 %v561_v35 }
 0x54e   : > { %v672_v36 = vpop.f32.mrb[8].mxu1 }
 0x54f   : > { %v673_v37 = vadd.f32 %v672_v36, %v3249_v27  ;;  %v2573_v40 = vpop.f32.mrb[9].mxu1 }
 0x550   : > { %v675_v41 = vpop.f32.mrb[10].mxu1 }
 0x551   : > { %v676_v42 = vadd.f32 %v675_v41, %v3249_v27  ;;  %v2574_v43 = vpop.f32.mrb[11].mxu1  ;;  %v679_v44 = vsel %vm557_vm5, %v673_v37, -inf }
 0x552   : > { %680 = vmax.xlane.f32.xlu0 %v679_v44 }
 0x553   : > { %v682_v45 = vsel %vm557_vm5, %v676_v42, -inf }
 0x556   : > { %683 = vmax.xlane.f32.xlu0 %v682_v45  ;;  %v793_v46 = vpop.f32.mrb[12].mxu1 }
 0x557   : > { %v794_v47 = vadd.f32 %v793_v46, %v3249_v27  ;;  %v2585_v48 = vpop.f32.mrb[13].mxu1 }
 0x558   : > { %v796_v49 = vpop.f32.mrb[14].mxu1 }
 0x559   : > { %v797_v50 = vadd.f32 %v796_v49, %v3249_v27  ;;  %v2586_v51 = vpop.f32.mrb[15].mxu1  ;;  %v800_v52 = vsel %vm557_vm5, %v794_v47, -inf }
 0x55a   : > { %801 = vmax.xlane.f32.xlu1 %v800_v52 }
 0x55b   : > { %v803_v53 = vsel %vm557_vm5, %v797_v50, -inf }
 0x55c   : > { %804 = vmax.xlane.f32.xlu0 %v803_v53 }
 0x55e   : > { %v914_v54 = vpop.f32.mrb[16].mxu1 }
 0x55f   : > { %v915_v55 = vadd.f32 %v914_v54, %v3249_v27  ;;  %v2597_v56 = vpop.f32.mrb[17].mxu1 }
 0x560   : > { %v917_v57 = vpop.f32.mrb[18].mxu1 }
 0x561   : > { %v918_v58 = vadd.f32 %v917_v57, %v3249_v27  ;;  %v2598_v59 = vpop.f32.mrb[19].mxu1  ;;  %v921_v60 = vsel %vm557_vm5, %v915_v55, -inf }
 0x562   : > { %922 = vmax.xlane.f32.xlu1 %v921_v60 }
 0x563   : > { %v924_v61 = vsel %vm557_vm5, %v918_v58, -inf }
 0x564   : > { %925 = vmax.xlane.f32.xlu0 %v924_v61 }
 0x573   : > { %581 = vrot.lane.b32.xlu1 %v3212_v11, %s3013_s5 }
 0x5d7   : > { %v560_v62 = vpop.xlane.xlu1 %559 }
 0x5d8   : > { %v564_v63 = vsub.f32 %v551_v29, %v560_v62 }
 0x5d9   : > { %v563_v0 = vpop.xlane.xlu0 %562 }
 0x5da   : > { %v566_v2 = vmul.f32 1.442695, %v564_v63  ;;  %v565_v3 = vsub.f32 %v554_v32, %v563_v0 }
 0x5dc   : > { %2853 = vpow2.f32 %v566_v2  ;;  %v568_v4 = vmul.f32 1.442695, %v565_v3 }
 0x5de   : > { %2855 = vpow2.f32 %v568_v4 }
 0x5df   : > { %v681_v5 = vpop.xlane.xlu0 %680 }
 0x5e0   : > { %v685_v6 = vsub.f32 %v673_v37, %v681_v5 }
 0x5e2   : > { %v687_v7 = vmul.f32 1.442695, %v685_v6 }
 0x5e3   : > { %v684_v8 = vpop.xlane.xlu0 %683 }
 0x5e4   : > { %2857 = vpow2.f32 %v687_v7  ;;  %v686_v9 = vsub.f32 %v676_v42, %v684_v8 }
 0x5e6   : > { %v2854_v10 = vpop.eup %2853  ;;  %v689_v12 = vmul.f32 1.442695, %v686_v9 }
 0x5e7   : > { %v802_v13 = vpop.xlane.xlu1 %801  ;;  %v570_v14 = vsel %vm557_vm5, %v2854_v10, 0.0 }
 0x5e8   : > { %v2856_v15 = vpop.eup %2855  ;;  %2859 = vpow2.f32 %v689_v12  ;;  %v806_v16 = vsub.f32 %v794_v47, %v802_v13  ;;  %571 = vadd.xlane.f32.xlu1 %v570_v14 }
 0x5e9   : > { %v805_v17 = vpop.xlane.xlu0 %804  ;;  %v573_v18 = vsel %vm557_vm5, %v2856_v15, 0.0 }
 0x5ea   : > { %v808_v19 = vmul.f32 1.442695, %v806_v16  ;;  %v807_v20 = vsub.f32 %v797_v50, %v805_v17  ;;  %574 = vadd.xlane.f32.xlu0 %v573_v18 }
 0x5ec   : > { %2861 = vpow2.f32 %v808_v19  ;;  %v810_v21 = vmul.f32 1.442695, %v807_v20  ;;  %v2829_v19 = vld [vmem:[%s3640_s1 + $0x90] sm:$0xff]  }
 0x5ed   : > { %2606 = vmatpush3.bf16.msra.mxu1 %v2829_v19 }
 0x5ee   : > { %v2858_v22 = vpop.eup %2857  ;;  %2863 = vpow2.f32 %v810_v21  ;;  %2607 = vmatprep.subr.bf16.mxu1 %v3003_v1 }
 0x5ef   : > { %v923_v23 = vpop.xlane.xlu1 %922  ;;  %v691_v24 = vsel %vm557_vm5, %v2858_v22, 0.0 }
 0x5f0   : > { %v927_v25 = vsub.f32 %v915_v55, %v923_v23  ;;  %692 = vadd.xlane.f32.xlu1 %v691_v24  ;;  %v2830_v24 = vld [vmem:[%s3640_s1 + $0x98] sm:$0xff]  }
 0x5f1   : > { %v926_v26 = vpop.xlane.xlu0 %925  ;;  %2608 = vmatpush3.bf16.msra.mxu1 %v2830_v24 }
 0x5f2   : > { %v2860_v28 = vpop.eup %2859  ;;  %v929_v29 = vmul.f32 1.442695, %v927_v25  ;;  %v928_v30 = vsub.f32 %v918_v58, %v926_v26  ;;  %2621 = vmatprep.subr.bf16.mxu1 %v3003_v1 }
 0x5f3   : > { %v582_v31 = vpop.permute.xlu1 %581  ;;  %v694_v32 = vsel %vm557_vm5, %v2860_v28, 0.0 }
 0x5f4   : > { %2865 = vpow2.f32 %v929_v29  ;;  %v931_v33 = vmul.f32 1.442695, %v928_v30  ;;  %2564 = vmatpush3.bf16.msra.mxu0 %v582_v31  ;;  %695 = vadd.xlane.f32.xlu0 %v694_v32 }
 0x5f5   : > { %2575 = vmatprep.subr.bf16.mxu0 %v3003_v1 }
 0x5f6   : > { %v2862_v34 = vpop.eup %2861  ;;  %2867 = vpow2.f32 %v931_v33 }
 0x5f7   : > { %v812_v35 = vsel %vm557_vm5, %v2862_v34, 0.0 }
 0x5f8   : > { %v2864_v36 = vpop.eup %2863  ;;  %813 = vadd.xlane.f32.xlu1 %v812_v35 }
 0x5f9   : > { %v815_v37 = vsel %vm557_vm5, %v2864_v36, 0.0 }
 0x5fa   : > { %816 = vadd.xlane.f32.xlu0 %v815_v37 }
 0x5fe   : > { %v2866_v40 = vpop.eup %2865 }
 0x5ff   : > { %v933_v41 = vsel %vm557_vm5, %v2866_v40, 0.0 }
 0x600   : > { %v2868_v42 = vpop.eup %2867  ;;  %934 = vadd.xlane.f32.xlu1 %v933_v41 }
 0x601   : > { %v936_v43 = vsel %vm557_vm5, %v2868_v42, 0.0 }
 0x602   : > { %937 = vadd.xlane.f32.xlu0 %v936_v43 }
 0x611   : > { %823 = vrot.lane.b32.xlu1 %v3212_v11, %s3014_s6 }
 0x615   : > { %944 = vrot.lane.b32.xlu1 %v3212_v11, %s3015_s7 }
 0x618   : > { %702 = vrot.lane.b32.xlu0 %v3212_v11, %s3016_s8 }
 0x675   : > { %v572_v44 = vpop.xlane.xlu1 %571 }
 0x676   : > { %2869 = vrcp.f32 %v572_v44 }
 0x677   : > { %v575_v45 = vpop.xlane.xlu0 %574 }
 0x678   : > { %2871 = vrcp.f32 %v575_v45 }
 0x67d   : > { %v693_v51 = vpop.xlane.xlu1 %692 }
 0x680   : > { %v2870_v46 = vpop.eup %2869 }
 0x681   : > { %v696_v47 = vpop.xlane.xlu0 %695  ;;  %v578_v49 = vmul.f32 %v2870_v46, %v2854_v10 }
 0x682   : > { %v2872_v48 = vpop.eup %2871  ;;  %2873 = vrcp.f32 %v696_v47 }
 0x683   : > { %v579_v50 = vmul.f32 %v2872_v48, %v2856_v15  ;;  %2875 = vrcp.f32 %v693_v51 }
 0x685   : > { %v580_v52 = vpack.c.bf16 %v579_v50, %v578_v49  ;;  %v814_v11 = vpop.xlane.xlu1 %813 }
 0x687   : > { %2566 = vmatmul.mubr.msk.bf16.vlgmr.msra.gmra.mrb[8].mxu0 %vm557_vm5, %v580_v52  ;;  %v817_v53 = vpop.xlane.xlu0 %816 }
 0x688   : > { %2577 = vmatprep.mubr.msk.bf16.mxu0 %vm3004_vm0, %v3003_v1  ;;  %2877 = vrcp.f32 %v817_v53  ;;  %v2380_v53 = vld [vmem:[%s3641_s2 + $0x15] ss:$0 sm:$0xff] }
 0x689   : > { %2879 = vrcp.f32 %v814_v11 }
 0x68c   : > { %v2874_v54 = vpop.eup %2873 }
 0x68d   : > { %v2876_v56 = vpop.eup %2875  ;;  %v700_v57 = vmul.f32 %v2874_v54, %v2860_v28  ;;  %v935_v58 = vpop.xlane.xlu1 %934 }
 0x68e   : > { %v699_v59 = vmul.f32 %v2876_v56, %v2858_v22 }
 0x68f   : > { %v938_v55 = vpop.xlane.xlu0 %937 }
 0x690   : > { %2881 = vrcp.f32 %v938_v55  ;;  %v701_v61 = vpack.c.bf16 %v700_v57, %v699_v59 }
 0x691   : > { %2883 = vrcp.f32 %v935_v58  ;;  %v824_v63 = vpop.permute.xlu1 %823 }
 0x692   : > { %v2878_v62 = vpop.eup %2877 }
 0x693   : > { %v703_v60 = vpop.permute.xlu0 %702  ;;  %v2880_v0 = vpop.eup %2879  ;;  %v821_v2 = vmul.f32 %v2878_v62, %v2864_v36 }
 0x694   : > { %2576 = vmatpush3.bf16.msra.mxu0 %v703_v60  ;;  %v820_v3 = vmul.f32 %v2880_v0, %v2862_v34 }
 0x695   : > { %2587 = vmatprep.subr.bf16.mxu0 %v3003_v1  ;;  %v945_v6 = vpop.permute.xlu1 %944 }
 0x696   : > { %v822_v4 = vpack.c.bf16 %v821_v2, %v820_v3 }
 0x697   : > { %2578 = vmatmul.mubr.msk.bf16.vlgmr.msra.gmra.mrb[12].mxu0 %vm557_vm5, %v701_v61 }
 0x698   : > { %2588 = vmatpush3.bf16.msra.mxu0 %v824_v63  ;;  %2589 = vmatprep.mubr.msk.bf16.mxu0 %vm3004_vm0, %v3003_v1 }
 0x699   : > { %2599 = vmatprep.subr.bf16.mxu0 %v3003_v1 }
 0x69a   : > { %v2882_v5 = vpop.eup %2881 }
 0x69b   : > { %v2884_v7 = vpop.eup %2883  ;;  %v942_v8 = vmul.f32 %v2882_v5, %v2868_v42 }
 0x69c   : > { %v941_v9 = vmul.f32 %v2884_v7, %v2866_v40  ;;  %v2831_v7 = vld [vmem:[%s3640_s1 + $0xa0] sm:$0xff]  }
 0x69e   : > { %v943_v10 = vpack.c.bf16 %v942_v8, %v941_v9  ;;  %v2832_v8 = vld [vmem:[%s3640_s1 + $0xa8] sm:$0xff]  }
 0x69f   : > { %2590 = vmatmul.mubr.msk.bf16.vlgmr.msra.gmra.mrb[16].mxu0 %vm557_vm5, %v822_v4 }
 0x6a0   : > { %2600 = vmatpush3.bf16.msra.mxu0 %v945_v6  ;;  %2601 = vmatprep.mubr.msk.bf16.mxu0 %vm3004_vm0, %v3003_v1 }
 0x6a1   : > { %2613 = vmatprep.subr.bf16.mxu0 %v3003_v1 }
 0x6a7   : > { %2602 = vmatmul.mubr.msk.bf16.vlgmr.msra.gmra.mrb[20].mxu0 %vm557_vm5, %v943_v10 }
 0x6a8   : > { %2617 = vmatprep.mubr.msk.bf16.mxu0 %vm3004_vm0, %v3003_v1  ;;  %2614 = vmatpush3.bf16.msra.mxu0 %v2831_v7  ;;  %v2837_v7 = vld [vmem:[%s3640_s1 + $0xd0] sm:$0xff]  }
 0x6a9   : > { %2615 = vmatprep.subr.bf16.mxu0 %v3003_v1 }
 0x6ac   : > { %2616 = vmatpush3.bf16.msra.mxu0 %v2832_v8  ;;  %v2838_v8 = vld [vmem:[%s3640_s1 + $0xd8] sm:$0xff]  }
 0x6ad   : > { %2633 = vmatprep.subr.bf16.mxu0 %v3003_v1 }
 0x75a   : > { %v621_v12 = vpop.f32.mrb[8].mxu0 }
 0x75b   : > { %v2567_v13 = vpop.f32.mrb[9].mxu0 }
 0x75c   : > { %v624_v14 = vpop.f32.mrb[10].mxu0 }
 0x75d   : > { %v2568_v15 = vpop.f32.mrb[11].mxu0 }
 0x76a   : > { %v742_v16 = vpop.f32.mrb[12].mxu0 }
 0x76b   : > { %v2579_v17 = vpop.f32.mrb[13].mxu0 }
 0x76c   : > { %v745_v18 = vpop.f32.mrb[14].mxu0 }
 0x76d   : > { %v2781_v20 = vpack.i.bf16 %v745_v18, %v742_v16  ;;  %v2580_v21 = vpop.f32.mrb[15].mxu0  ;;  %v2381_v18 = vld [vmem:[%s3641_s2 + $0x16] ss:$0 sm:$0xff] }
 0x76f   : > { %2782 = vrot.lane.b32.xlu1 %v2781_v20, %s3645_s11 }
 0x772   : > { %v863_v22 = vpop.f32.mrb[16].mxu0 }
 0x773   : > { %v2591_v23 = vpop.f32.mrb[17].mxu0 }
 0x774   : > { %v866_v25 = vpop.f32.mrb[18].mxu0 }
 0x775   : > { %v2786_v26 = vpack.i.bf16 %v866_v25, %v863_v22  ;;  %v2592_v28 = vpop.f32.mrb[19].mxu0  ;;  %v2382_v22 = vld [vmem:[%s3641_s2 + $0x17] ss:$0 sm:$0xff] }
 0x776   : > { %v2833_v28 = vld [vmem:[%s3640_s1 + $0xb0] sm:$0xff]  }
 0x777   : > { %2787 = vrot.lane.b32.xlu0 %v2786_v26, %s3644_s20  ;;  %s2943_s20 = sshll.u32 %s3020_s10, 4  ;;  %s2944_s20 = int_to_ptr.vmem [resolvable:$false] %s2943_s20 }
 0x77a   : > { %v984_v29 = vpop.f32.mrb[20].mxu0 }
 0x77b   : > { %v2603_v30 = vpop.f32.mrb[21].mxu0 }
 0x77c   : > { %v987_v31 = vpop.f32.mrb[22].mxu0  ;;  %v2835_v30 = vld [vmem:[%s3640_s1 + $0xc0] sm:$0xff]  }
 0x77d   : > { %v2791_v32 = vpack.i.bf16 %v987_v31, %v984_v29  ;;  %v2604_v33 = vpop.f32.mrb[23].mxu0  ;;  %v2834_v29 = vld [vmem:[%s3640_s1 + $0xb8] sm:$0xff]   ;;  %v2836_v31 = vld [vmem:[%s3640_s1 + $0xc8] sm:$0xff]  }
 0x77f   : > { %2792 = vrot.lane.b32.xlu1 %v2791_v32, %s3643_s24  ;;  %v2383_v32 = vld [vmem:[%s3641_s2 + $0x18] ss:$0 sm:$0xff]  ;;  %s2945_s24 = scalar_lea.vmem %s2944_s20, 32 }
 0x7e1   : > { %v2783_v34 = vpop.permute.xlu1 %2782 }
 0x7e2   : > { %v2785_v36 = vunpack.i.h.bf16 %v2783_v34  ;;  %v2784_v37 = vunpack.i.l.bf16 %v2783_v34 }
 0x7e4   : > { %v1016_v43 = vsel %vm509_vm3, %v624_v14, %v2785_v36  ;;  %v1015_v44 = vsel %vm509_vm3, %v621_v12, %v2784_v37 }
 0x7e9   : > { %v2788_v35 = vpop.permute.xlu0 %2787 }
 0x7ea   : > { %v2790_v40 = vunpack.i.h.bf16 %v2788_v35  ;;  %v2789_v41 = vunpack.i.l.bf16 %v2788_v35 }
 0x7ec   : > { %v1018_v47 = vsel %vm557_vm5, %v1016_v43, %v2790_v40  ;;  %v1017_v48 = vsel %vm557_vm5, %v1015_v44, %v2789_v41 }
 0x7f1   : > { %v2793_v42 = vpop.permute.xlu1 %2792 }
 0x7f2   : > { %v2795_v45 = vunpack.i.h.bf16 %v2793_v42  ;;  %v2794_v46 = vunpack.i.l.bf16 %v2793_v42 }
 0x7f4   : > { %v1021_v49 = vsel %vm1019_vm6, %v1018_v47, %v2795_v45  ;;  %v1020_v50 = vsel %vm1019_vm6, %v1017_v48, %v2794_v46 }
 0x7f5   : > { %v1026_v51 = vpack.c.bf16 %v1021_v49, %v1020_v50 }
 0x7f7   : > { %2610 = vmatmul.mubr.msk.bf16.vlgmr.msra.gmra.mrb[20].mxu1 %vm404_vm2, %v1026_v51 }
 0x7f8   : > { %2629 = vmatprep.mubr.msk.bf16.mxu1 %vm3004_vm0, %v3003_v1  ;;  %2622 = vmatpush3.bf16.msra.mxu1 %v2833_v28 }
 0x7f9   : > { %2623 = vmatprep.subr.bf16.mxu1 %v3003_v1 }
 0x7fc   : > { %2624 = vmatpush3.bf16.msra.mxu1 %v2834_v29 }
 0x7fd   : > { %2625 = vmatprep.subr.bf16.mxu1 %v3003_v1 }
 0x800   : > { %2626 = vmatpush3.bf16.msra.mxu1 %v2835_v30 }
 0x801   : > { %2627 = vmatprep.subr.bf16.mxu1 %v3003_v1 }
 0x804   : > { %2628 = vmatpush3.bf16.msra.mxu1 %v2836_v31 }
 0x805   : > { %2647 = vmatprep.subr.bf16.mxu1 %v3003_v1 }
 0x8ca   : > { %v1076_v52 = vpop.f32.mrb[20].mxu1 }
 0x8cb   : > { %v1083_v11 = vadd.f32 %v1076_v52, %v3183_v38  ;;  %v2611_v54 = vpop.f32.mrb[21].mxu1 }
 0x8cc   : > { %v1079_v55 = vpop.f32.mrb[22].mxu1 }
 0x8cd   : > { %v3323_v56 = vadd.f32 %v2380_v53, %v1083_v11  ;;  %v1084_v57 = vadd.f32 %v1079_v55, %v3185_v39  ;;  %v2612_v58 = vpop.f32.mrb[23].mxu1 }
 0x8cf   : > { %v3326_v59 = vadd.f32 %v2380_v53, %v1084_v57  ;;  %v1094_v60 = vsel %vm404_vm2, %v3323_v56, 0.0  ;;  %v2392_v53 = vld [vmem:[%s3641_s2 + $0x19] ss:$0 sm:$0xff] }
 0x8d0   : > { %1095 = vadd.xlane.f32.xlu0 %v1094_v60 }
 0x8d1   : > { %v1097_v61 = vsel %vm404_vm2, %v3326_v59, 0.0 }
 0x8d2   : > { %1098 = vadd.xlane.f32.xlu1 %v1097_v61 }
 0x95d   : > { %v1096_v62 = vpop.xlane.xlu0 %1095 }
 0x95e   : > { %v1100_v63 = vmul.f32 0.03125, %v1096_v62 }
 0x95f   : > { %v1099_v38 = vpop.xlane.xlu1 %1098 }
 0x960   : > { %v1102_v0 = vsub.f32 %v3323_v56, %v1100_v63  ;;  %v1101_v2 = vmul.f32 0.03125, %v1099_v38 }
 0x962   : > { %v1103_v3 = vsub.f32 %v3326_v59, %v1101_v2  ;;  %v1104_v39 = vmul.f32 %v1102_v0, %v1102_v0 }
 0x964   : > { %v1106_v4 = vsel %vm404_vm2, %v1104_v39, 0.0  ;;  %v1105_v5 = vmul.f32 %v1103_v3, %v1103_v3 }
 0x965   : > { %1107 = vadd.xlane.f32.xlu0 %v1106_v4 }
 0x966   : > { %v1109_v6 = vsel %vm404_vm2, %v1105_v5, 0.0 }
 0x969   : > { %1110 = vadd.xlane.f32.xlu0 %v1109_v6 }
 0x9f2   : > { %v1108_v9 = vpop.xlane.xlu0 %1107 }
 0x9f3   : > { %v1112_v10 = vmul.f32 0.03125, %v1108_v9 }
 0x9f5   : > { %v1114_v12 = vadd.f32 1e-05, %v1112_v10 }
 0x9f6   : > { %v1111_v13 = vpop.xlane.xlu0 %1110 }
 0x9f7   : > { %2885 = vrsqrt.f32 %v1114_v12  ;;  %v1113_v14 = vmul.f32 0.03125, %v1111_v13 }
 0x9f9   : > { %v1115_v15 = vadd.f32 1e-05, %v1113_v14 }
 0x9fb   : > { %2887 = vrsqrt.f32 %v1115_v15 }
 0xa01   : > { %v2886_v16 = vpop.eup %2885 }
 0xa02   : > { %v1118_v17 = vmul.f32 %v2886_v16, %v1102_v0 }
 0xa04   : > { %v1124_v20 = vmul.f32 %v2381_v18, %v1118_v17  ;;  %v2393_v17 = vld [vmem:[%s3641_s2 + $0x1a] ss:$0 sm:$0xff] }
 0xa05   : > { %v2888_v19 = vpop.eup %2887 }
 0xa06   : > { %v1119_v21 = vmul.f32 %v2888_v19, %v1103_v3  ;;  %v1130_v24 = vadd.f32 %v2382_v22, %v1124_v20 }
 0xa08   : > { %v1125_v23 = vmul.f32 %v2381_v18, %v1119_v21 }
 0xa0a   : > { %v1131_v25 = vadd.f32 %v2382_v22, %v1125_v23  ;;  %v2394_v22 = vld [vmem:[%s3641_s2 + $0x1b] ss:$0 sm:$0xff] }
 0xa0c   : > { %v1136_v26 = vpack.c.bf16 %v1131_v25, %v1130_v24 }
 0xa0e   : > { %2618 = vmatmul.mubr.msk.bf16.vlgmr.msra.gmra.mrb[24].mxu0 %vm404_vm2, %v1136_v26 }
 0xa0f   : > { %2637 = vmatprep.mubr.msk.bf16.mxu0 %vm3004_vm0, %v3003_v1  ;;  %2634 = vmatpush3.bf16.msra.mxu0 %v2837_v7 }
 0xa10   : > { %2635 = vmatprep.subr.bf16.mxu0 %v3003_v1 }
 0xa13   : > { %2636 = vmatpush3.bf16.msra.mxu0 %v2838_v8 }
 0xa14   : > { %2641 = vmatprep.subr.bf16.mxu0 %v3003_v1 }
 0xae1   : > { %v1191_v33 = vpop.f32.mrb[24].mxu0 }
 0xae2   : > { %v1192_v34 = vadd.f32 %v2383_v32, %v1191_v33  ;;  %v2619_v35 = vpop.f32.mrb[25].mxu0 }
 0xae3   : > { %v1194_v36 = vpop.f32.mrb[26].mxu0 }
 0xae4   : > { %v1200_v37 = vmul.f32 0.70710677, %v1192_v34  ;;  %v1195_v40 = vadd.f32 %v2383_v32, %v1194_v36  ;;  %v2620_v41 = vpop.f32.mrb[27].mxu0  ;;  %v1198_v46 = vmul.f32 0.5, %v1192_v34 }
 0xae6   : > { %2889 = verf.f32 %v1200_v37  ;;  %v1201_v42 = vmul.f32 0.70710677, %v1195_v40  ;;  %v1199_v47 = vmul.f32 0.5, %v1195_v40 }
 0xae8   : > { %2891 = verf.f32 %v1201_v42 }
 0xaf0   : > { %v2890_v43 = vpop.eup %2889 }
 0xaf1   : > { %v1204_v44 = vadd.f32 1.0, %v2890_v43 }
 0xaf2   : > { %v2892_v45 = vpop.eup %2891 }
 0xaf3   : > { %v1205_v48 = vadd.f32 1.0, %v2892_v45  ;;  %v1206_v49 = vmul.f32 %v1204_v44, %v1198_v46 }
 0xaf5   : > { %v1207_v50 = vmul.f32 %v1205_v48, %v1199_v47 }
 0xaf7   : > { %v1216_v51 = vpack.c.bf16 %v1207_v50, %v1206_v49 }
 0xaf9   : > { %2630 = vmatmul.mubr.msk.bf16.vlgmr.msra.gmra.mrb[24].mxu1 %vm1241_vm7, %v1216_v51 }
 0xafa   : > { %2649 = vmatprep.mubr.msk.bf16.mxu1 %vm3004_vm0, %v3003_v1 }
 0xbcc   : > { %v1279_v52 = vpop.f32.mrb[24].mxu1 }
 0xbcd   : > { %v1286_v11 = vadd.f32 %v1279_v52, %v3323_v56  ;;  %v2631_v54 = vpop.f32.mrb[25].mxu1 }
 0xbce   : > { %v1282_v55 = vpop.f32.mrb[26].mxu1 }
 0xbcf   : > { %v3379_v57 = vadd.f32 %v2392_v53, %v1286_v11  ;;  %v1287_v58 = vadd.f32 %v1282_v55, %v3326_v59  ;;  %v2632_v60 = vpop.f32.mrb[27].mxu1 }
 0xbd1   : > { %v3382_v61 = vadd.f32 %v2392_v53, %v1287_v58  ;;  %v1297_v62 = vsel %vm404_vm2, %v3379_v57, 0.0 }
 0xbd2   : > { %1298 = vadd.xlane.f32.xlu0 %v1297_v62 }
 0xbd3   : > { %v1300_v63 = vsel %vm404_vm2, %v3382_v61, 0.0 }
 0xbd4   : > { %1301 = vadd.xlane.f32.xlu1 %v1300_v63 }
 0xc5f   : > { %v1299_v38 = vpop.xlane.xlu0 %1298 }
 0xc60   : > { %v1303_v0 = vmul.f32 0.03125, %v1299_v38 }
 0xc61   : > { %v1302_v56 = vpop.xlane.xlu1 %1301 }
 0xc62   : > { %v1305_v2 = vsub.f32 %v3379_v57, %v1303_v0  ;;  %v1304_v3 = vmul.f32 0.03125, %v1302_v56 }
 0xc64   : > { %v1306_v39 = vsub.f32 %v3382_v61, %v1304_v3  ;;  %v1307_v59 = vmul.f32 %v1305_v2, %v1305_v2 }
 0xc66   : > { %v1309_v4 = vsel %vm404_vm2, %v1307_v59, 0.0  ;;  %v1308_v5 = vmul.f32 %v1306_v39, %v1306_v39 }
 0xc67   : > { %1310 = vadd.xlane.f32.xlu0 %v1309_v4 }
 0xc68   : > { %v1312_v6 = vsel %vm404_vm2, %v1308_v5, 0.0 }
 0xc69   : > { %1313 = vadd.xlane.f32.xlu1 %v1312_v6 }
 0xcf4   : > { %v1311_v9 = vpop.xlane.xlu0 %1310 }
 0xcf5   : > { %v1315_v10 = vmul.f32 0.03125, %v1311_v9 }
 0xcf6   : > { %v1314_v12 = vpop.xlane.xlu1 %1313 }
 0xcf7   : > { %v1317_v13 = vadd.f32 1e-05, %v1315_v10  ;;  %v1316_v14 = vmul.f32 0.03125, %v1314_v12 }
 0xcf9   : > { %2893 = vrsqrt.f32 %v1317_v13  ;;  %v1318_v15 = vadd.f32 1e-05, %v1316_v14 }
 0xcfb   : > { %2895 = vrsqrt.f32 %v1318_v15 }
 0xd03   : > { %v2894_v16 = vpop.eup %2893 }
 0xd04   : > { %v1321_v18 = vmul.f32 %v2894_v16, %v1305_v2 }
 0xd05   : > { %v2896_v19 = vpop.eup %2895 }
 0xd06   : > { %v1327_v20 = vmul.f32 %v2393_v17, %v1321_v18  ;;  %v1322_v21 = vmul.f32 %v2896_v19, %v1306_v39 }
 0xd08   : > { %v1328_v23 = vmul.f32 %v2393_v17, %v1322_v21  ;;  %v1333_v24 = vadd.f32 %v2394_v22, %v1327_v20 }
 0xd0a   : > { %v1334_v25 = vadd.f32 %v2394_v22, %v1328_v23 }
 0xd0c   : > { %v1339_v26 = vpack.c.bf16 %v1334_v25, %v1333_v24 }
 0xd0e   : > { %2638 = vmatmul.mubr.msk.bf16.vlgmr.msra.gmra.mrb[28].mxu0 %vm404_vm2, %v1339_v26 }
 0xd0f   : > { %2643 = vmatprep.mubr.msk.bf16.mxu0 %vm3004_vm0, %v3003_v1 }
 0xde1   : > { %v1389_v28 = vpop.f32.mrb[28].mxu0 }
 0xde2   : > { %v2639_v29 = vpop.f32.mrb[29].mxu0 }
 0xde3   : > { %v1392_v30 = vpop.f32.mrb[30].mxu0 }
 0xde4   : > { %v3409_v31 = vpack.c.bf16 %v1392_v30, %v1389_v28  ;;  %v2640_v32 = vpop.f32.mrb[31].mxu0 }
 0xde6   : > { %1519 = vrot.lane.b32.xlu1 %v3409_v31, %s3005_s25  ;;  %1398 = vrot.lane.b32.xlu0 %v3409_v31, %s3006_s26  ;;  %s159_s26 = sand.u32 1, %s2993_s13  }
 0xdea   : > { %1517 = vrot.lane.b32.xlu1 %v3409_v31, %s3007_s27  ;;  %1638 = vrot.lane.b32.xlu0 %v3409_v31, %s3008_s28  ;;  %s3648_s27 = smov 8  }
 0xdee   : > { %1640 = vrot.lane.b32.xlu1 %v3409_v31, %s3009_s29  ;;  %1759 = vrot.lane.b32.xlu0 %v3409_v31, %s3010_s30  ;;  %s3649_s30 = smov 16   ;;  %s2425_s29 = sshll.u32 %s3062_s16, 4 }
 0xdf2   : > { %1761 = vrot.lane.b32.xlu1 %v3409_v31, %s3011_s4  ;;  %s3650_s4 = smov 24  }
 0xe58   : > { %v1399_v33 = vpop.permute.xlu0 %1398  ;;  %v1520_v35 = vpop.permute.xlu1 %1519 }
 0xe59   : > { %v1404_v34 = vsel %vm509_vm3, %v1399_v33, 0  ;;  %v1525_v37 = vsel %vm509_vm3, %v1520_v35, 0 }
 0xe5a   : > { %2642 = vmatpush3.bf16.xpose.msra.mxu0 %v1404_v34 }
 0xe5b   : > { %2653 = vmatprep.subr.bf16.mxu0 %v3003_v1 }
 0xe5c   : > { %v1518_v36 = vpop.permute.xlu1 %1517  ;;  %v1639_v43 = vpop.permute.xlu0 %1638 }
 0xe60   : > { %v1641_v40 = vpop.permute.xlu1 %1640  ;;  %v1760_v45 = vpop.permute.xlu0 %1759 }
 0xe61   : > { %2644 = vmatmul.mubr.msk.bf16.vlgmr.msra.gmra.mrb[32].mxu0 %vm509_vm3, %v3409_v31  ;;  %v1646_v41 = vsel %vm509_vm3, %v1641_v40, 0 }
 0xe62   : > { %2654 = vmatpush3.bf16.xpose.msra.mxu0 %v1525_v37  ;;  %2655 = vmatprep.mubr.msk.bf16.mxu0 %vm3004_vm0, %v3003_v1 }
 0xe63   : > { %2665 = vmatprep.subr.bf16.mxu0 %v3003_v1 }
 0xe64   : > { %v1762_v42 = vpop.permute.xlu1 %1761 }
 0xe65   : > { %v1767_v44 = vsel %vm509_vm3, %v1762_v42, 0 }
 0xe69   : > { %2656 = vmatmul.mubr.msk.bf16.vlgmr.msra.gmra.mrb[36].mxu0 %vm509_vm3, %v1518_v36 }
 0xe6a   : > { %2666 = vmatpush3.bf16.xpose.msra.mxu0 %v1646_v41  ;;  %2667 = vmatprep.mubr.msk.bf16.mxu0 %vm3004_vm0, %v3003_v1 }
 0xe6b   : > { %2677 = vmatprep.subr.bf16.mxu0 %v3003_v1 }
 0xe71   : > { %2668 = vmatmul.mubr.msk.bf16.vlgmr.msra.gmra.mrb[40].mxu0 %vm509_vm3, %v1639_v43 }
 0xe72   : > { %2678 = vmatpush3.bf16.xpose.msra.mxu0 %v1767_v44  ;;  %2679 = vmatprep.mubr.msk.bf16.mxu0 %vm3004_vm0, %v3003_v1 }
 0xe73   : > { %2689 = vmatprep.subr.bf16.mxu0 %v3003_v1 }
 0xe79   : > { %2680 = vmatmul.mubr.msk.bf16.vlgmr.msra.gmra.mrb[44].mxu0 %vm509_vm3, %v1760_v45 }
 0xe7a   : > { %2693 = vmatprep.mubr.msk.bf16.mxu0 %vm3004_vm0, %v3003_v1 }
 0xf34   : > { %v1440_v46 = vpop.f32.mrb[32].mxu0 }
 0xf35   : > { %v1441_v47 = vadd.f32 %v1440_v46, %v3249_v27  ;;  %v2645_v48 = vpop.f32.mrb[33].mxu0 }
 0xf36   : > { %v1443_v49 = vpop.f32.mrb[34].mxu0 }
 0xf37   : > { %v1444_v50 = vadd.f32 %v1443_v49, %v3249_v27  ;;  %v2646_v51 = vpop.f32.mrb[35].mxu0  ;;  %v1447_v52 = vsel %vm557_vm5, %v1441_v47, -inf }
 0xf38   : > { %1448 = vmax.xlane.f32.xlu1 %v1447_v52 }
 0xf39   : > { %v1450_v53 = vsel %vm557_vm5, %v1444_v50, -inf }
 0xf3a   : > { %1451 = vmax.xlane.f32.xlu0 %v1450_v53 }
 0xf3c   : > { %v1561_v11 = vpop.f32.mrb[36].mxu0 }
 0xf3d   : > { %v1562_v54 = vadd.f32 %v1561_v11, %v3249_v27  ;;  %v2657_v55 = vpop.f32.mrb[37].mxu0 }
 0xf3e   : > { %v1564_v58 = vpop.f32.mrb[38].mxu0 }
 0xf3f   : > { %v1565_v60 = vadd.f32 %v1564_v58, %v3249_v27  ;;  %v2658_v62 = vpop.f32.mrb[39].mxu0  ;;  %v1568_v63 = vsel %vm557_vm5, %v1562_v54, -inf }
 0xf40   : > { %1569 = vmax.xlane.f32.xlu0 %v1568_v63 }
 0xf41   : > { %v1571_v38 = vsel %vm557_vm5, %v1565_v60, -inf }
 0xf44   : > { %1572 = vmax.xlane.f32.xlu0 %v1571_v38  ;;  %v1682_v0 = vpop.f32.mrb[40].mxu0 }
 0xf45   : > { %v1683_v56 = vadd.f32 %v1682_v0, %v3249_v27  ;;  %v2669_v2 = vpop.f32.mrb[41].mxu0 }
 0xf46   : > { %v1685_v3 = vpop.f32.mrb[42].mxu0 }
 0xf47   : > { %v1686_v39 = vadd.f32 %v1685_v3, %v3249_v27  ;;  %v2670_v59 = vpop.f32.mrb[43].mxu0  ;;  %v1689_v4 = vsel %vm557_vm5, %v1683_v56, -inf }
 0xf48   : > { %1690 = vmax.xlane.f32.xlu1 %v1689_v4 }
 0xf49   : > { %v1692_v5 = vsel %vm557_vm5, %v1686_v39, -inf }
 0xf4a   : > { %1693 = vmax.xlane.f32.xlu0 %v1692_v5 }
 0xf4c   : > { %v1803_v6 = vpop.f32.mrb[44].mxu0 }
 0xf4d   : > { %v1804_v7 = vadd.f32 %v1803_v6, %v3249_v27  ;;  %v2681_v8 = vpop.f32.mrb[45].mxu0 }
 0xf4e   : > { %v1806_v9 = vpop.f32.mrb[46].mxu0 }
 0xf4f   : > { %v1807_v10 = vadd.f32 %v1806_v9, %v3249_v27  ;;  %v2682_v12 = vpop.f32.mrb[47].mxu0  ;;  %v1810_v13 = vsel %vm557_vm5, %v1804_v7, -inf }
 0xf50   : > { %1811 = vmax.xlane.f32.xlu1 %v1810_v13 }
 0xf51   : > { %v1813_v14 = vsel %vm557_vm5, %v1807_v10, -inf }
 0xf52   : > { %1814 = vmax.xlane.f32.xlu0 %v1813_v14 }
 0xf61   : > { %1470 = vrot.lane.b32.xlu1 %v3409_v31, %s3013_s5 }
 0xfc5   : > { %v1449_v15 = vpop.xlane.xlu1 %1448 }
 0xfc6   : > { %v1453_v16 = vsub.f32 %v1441_v47, %v1449_v15 }
 0xfc7   : > { %v1452_v17 = vpop.xlane.xlu0 %1451 }
 0xfc8   : > { %v1455_v18 = vmul.f32 1.442695, %v1453_v16  ;;  %v1454_v19 = vsub.f32 %v1444_v50, %v1452_v17 }
 0xfca   : > { %2897 = vpow2.f32 %v1455_v18  ;;  %v1457_v20 = vmul.f32 1.442695, %v1454_v19 }
 0xfcc   : > { %2899 = vpow2.f32 %v1457_v20 }
 0xfcd   : > { %v1570_v21 = vpop.xlane.xlu0 %1569 }
 0xfce   : > { %v1574_v27 = vsub.f32 %v1562_v54, %v1570_v21 }
 0xfd0   : > { %v1576_v22 = vmul.f32 1.442695, %v1574_v27 }
 0xfd1   : > { %v1573_v23 = vpop.xlane.xlu0 %1572 }
 0xfd2   : > { %2901 = vpow2.f32 %v1576_v22  ;;  %v1575_v24 = vsub.f32 %v1565_v60, %v1573_v23 }
 0xfd4   : > { %v2898_v25 = vpop.eup %2897  ;;  %v1578_v26 = vmul.f32 1.442695, %v1575_v24 }
 0xfd5   : > { %v1691_v28 = vpop.xlane.xlu1 %1690  ;;  %v1459_v29 = vsel %vm557_vm5, %v2898_v25, 0.0 }
 0xfd6   : > { %v2900_v30 = vpop.eup %2899  ;;  %2903 = vpow2.f32 %v1578_v26  ;;  %v1695_v32 = vsub.f32 %v1683_v56, %v1691_v28  ;;  %1460 = vadd.xlane.f32.xlu1 %v1459_v29 }
 0xfd7   : > { %v1694_v33 = vpop.xlane.xlu0 %1693  ;;  %v1462_v34 = vsel %vm557_vm5, %v2900_v30, 0.0 }
 0xfd8   : > { %v1697_v35 = vmul.f32 1.442695, %v1695_v32  ;;  %v1696_v36 = vsub.f32 %v1686_v39, %v1694_v33  ;;  %1463 = vadd.xlane.f32.xlu0 %v1462_v34  ;;  %v2839_v34 = vld [vmem:[%s3640_s1 + $0xe0] sm:$0xff]  }
 0xfd9   : > { %2690 = vmatpush3.bf16.msra.mxu0 %v2839_v34 }
 0xfda   : > { %2905 = vpow2.f32 %v1697_v35  ;;  %v1699_v37 = vmul.f32 1.442695, %v1696_v36  ;;  %2691 = vmatprep.subr.bf16.mxu0 %v3003_v1 }
 0xfdc   : > { %v2902_v40 = vpop.eup %2901  ;;  %2907 = vpow2.f32 %v1699_v37 }
 0xfdd   : > { %v1812_v41 = vpop.xlane.xlu1 %1811  ;;  %v1580_v42 = vsel %vm557_vm5, %v2902_v40, 0.0 }
 0xfde   : > { %v1816_v43 = vsub.f32 %v1804_v7, %v1812_v41  ;;  %1581 = vadd.xlane.f32.xlu1 %v1580_v42  ;;  %v2840_v41 = vld [vmem:[%s3640_s1 + $0xe8] sm:$0xff]  }
 0xfdf   : > { %v1815_v44 = vpop.xlane.xlu0 %1814  ;;  %2692 = vmatpush3.bf16.msra.mxu0 %v2840_v41 }
 0xfe0   : > { %v2904_v45 = vpop.eup %2903  ;;  %v1818_v46 = vmul.f32 1.442695, %v1816_v43  ;;  %v1817_v47 = vsub.f32 %v1807_v10, %v1815_v44  ;;  %2705 = vmatprep.subr.bf16.mxu0 %v3003_v1 }
 0xfe1   : > { %v1471_v48 = vpop.permute.xlu1 %1470  ;;  %v1583_v49 = vsel %vm557_vm5, %v2904_v45, 0.0 }
 0xfe2   : > { %2909 = vpow2.f32 %v1818_v46  ;;  %v1820_v50 = vmul.f32 1.442695, %v1817_v47  ;;  %2648 = vmatpush3.bf16.msra.mxu1 %v1471_v48  ;;  %1584 = vadd.xlane.f32.xlu0 %v1583_v49 }
 0xfe3   : > { %2659 = vmatprep.subr.bf16.mxu1 %v3003_v1 }
 0xfe4   : > { %v2906_v51 = vpop.eup %2905  ;;  %2911 = vpow2.f32 %v1820_v50 }
 0xfe5   : > { %v1701_v52 = vsel %vm557_vm5, %v2906_v51, 0.0 }
 0xfe6   : > { %v2908_v53 = vpop.eup %2907  ;;  %1702 = vadd.xlane.f32.xlu1 %v1701_v52 }
 0xfe7   : > { %v1704_v11 = vsel %vm557_vm5, %v2908_v53, 0.0 }
 0xfe8   : > { %1705 = vadd.xlane.f32.xlu0 %v1704_v11 }
 0xfec   : > { %v2910_v54 = vpop.eup %2909 }
 0xfed   : > { %v1822_v55 = vsel %vm557_vm5, %v2910_v54, 0.0 }
 0xfee   : > { %v2912_v58 = vpop.eup %2911  ;;  %1823 = vadd.xlane.f32.xlu1 %v1822_v55 }
 0xfef   : > { %v1825_v60 = vsel %vm557_vm5, %v2912_v58, 0.0 }
 0xff0   : > { %1826 = vadd.xlane.f32.xlu0 %v1825_v60 }
 0xfff   : > { %1712 = vrot.lane.b32.xlu1 %v3409_v31, %s3014_s6 }
0x1003   : > { %1833 = vrot.lane.b32.xlu1 %v3409_v31, %s3015_s7  ;;  %s3597_s7 = scalar_lea.hbm %s3642_s3, %s2425_s29 }
0x1006   : > { %1591 = vrot.lane.b32.xlu0 %v3409_v31, %s3016_s8  ;;  %s2274_s8 = scalar_lea.sflag [#allocation3], %s159_s26 }
0x1063   : > { %v1461_v62 = vpop.xlane.xlu1 %1460 }
0x1064   : > { %2913 = vrcp.f32 %v1461_v62 }
0x1065   : > { %v1464_v63 = vpop.xlane.xlu0 %1463 }
0x1066   : > { %2915 = vrcp.f32 %v1464_v63 }
0x106b   : > { %v1582_v39 = vpop.xlane.xlu1 %1581 }
0x106e   : > { %v2914_v38 = vpop.eup %2913 }
0x106f   : > { %v1585_v0 = vpop.xlane.xlu0 %1584  ;;  %v1467_v2 = vmul.f32 %v2914_v38, %v2898_v25 }
0x1070   : > { %v2916_v56 = vpop.eup %2915  ;;  %2917 = vrcp.f32 %v1585_v0 }
0x1071   : > { %v1468_v3 = vmul.f32 %v2916_v56, %v2900_v30  ;;  %2919 = vrcp.f32 %v1582_v39 }
0x1073   : > { %v1469_v59 = vpack.c.bf16 %v1468_v3, %v1467_v2  ;;  %v1703_v31 = vpop.xlane.xlu1 %1702 }
0x1075   : > { %2650 = vmatmul.mubr.msk.bf16.vlgmr.msra.gmra.mrb[28].mxu1 %vm557_vm5, %v1469_v59  ;;  %v1706_v4 = vpop.xlane.xlu0 %1705  ;;  %v2409_v59 = vld [vmem:[%s3641_s2 + $0x1c] ss:$0 sm:$0xff] }
0x1076   : > { %2661 = vmatprep.mubr.msk.bf16.mxu1 %vm3004_vm0, %v3003_v1  ;;  %2921 = vrcp.f32 %v1706_v4 }
0x1077   : > { %2923 = vrcp.f32 %v1703_v31 }
0x107a   : > { %v2918_v5 = vpop.eup %2917 }
0x107b   : > { %v2920_v7 = vpop.eup %2919  ;;  %v1589_v8 = vmul.f32 %v2918_v5, %v2904_v45  ;;  %v1824_v9 = vpop.xlane.xlu1 %1823 }
0x107c   : > { %v1588_v10 = vmul.f32 %v2920_v7, %v2902_v40 }
0x107d   : > { %v1827_v6 = vpop.xlane.xlu0 %1826 }
0x107e   : > { %2925 = vrcp.f32 %v1827_v6  ;;  %v1590_v13 = vpack.c.bf16 %v1589_v8, %v1588_v10 }
0x107f   : > { %2927 = vrcp.f32 %v1824_v9  ;;  %v1713_v15 = vpop.permute.xlu1 %1712 }
0x1080   : > { %v2922_v14 = vpop.eup %2921 }
0x1081   : > { %v1592_v12 = vpop.permute.xlu0 %1591  ;;  %v2924_v16 = vpop.eup %2923  ;;  %v1710_v17 = vmul.f32 %v2922_v14, %v2908_v53 }
0x1082   : > { %2660 = vmatpush3.bf16.msra.mxu1 %v1592_v12  ;;  %v1709_v18 = vmul.f32 %v2924_v16, %v2906_v51 }
0x1083   : > { %2671 = vmatprep.subr.bf16.mxu1 %v3003_v1  ;;  %v1834_v21 = vpop.permute.xlu1 %1833 }
0x1084   : > { %v1711_v19 = vpack.c.bf16 %v1710_v17, %v1709_v18 }
0x1085   : > { %2662 = vmatmul.mubr.msk.bf16.vlgmr.msra.gmra.mrb[32].mxu1 %vm557_vm5, %v1590_v13 }
0x1086   : > { %2672 = vmatpush3.bf16.msra.mxu1 %v1713_v15  ;;  %2673 = vmatprep.mubr.msk.bf16.mxu1 %vm3004_vm0, %v3003_v1 }
0x1087   : > { %2683 = vmatprep.subr.bf16.mxu1 %v3003_v1 }
0x1088   : > { %v2926_v20 = vpop.eup %2925 }
0x1089   : > { %v2928_v27 = vpop.eup %2927  ;;  %v1831_v22 = vmul.f32 %v2926_v20, %v2912_v58 }
0x108a   : > { %v1830_v23 = vmul.f32 %v2928_v27, %v2910_v54  ;;  %v2842_v27 = vld [vmem:[%s3640_s1 + $0xf8] sm:$0xff]  }
0x108c   : > { %v1832_v24 = vpack.c.bf16 %v1831_v22, %v1830_v23 }
0x108d   : > { %2674 = vmatmul.mubr.msk.bf16.vlgmr.msra.gmra.mrb[36].mxu1 %vm557_vm5, %v1711_v19 }
0x108e   : > { %2684 = vmatpush3.bf16.msra.mxu1 %v1834_v21  ;;  %2685 = vmatprep.mubr.msk.bf16.mxu1 %vm3004_vm0, %v3003_v1  ;;  %v2841_v21 = vld [vmem:[%s3640_s1 + $0xf0] sm:$0xff]  }
0x108f   : > { %2697 = vmatprep.subr.bf16.mxu1 %v3003_v1 }
0x1095   : > { %2686 = vmatmul.mubr.msk.bf16.vlgmr.msra.gmra.mrb[40].mxu1 %vm557_vm5, %v1832_v24 }
0x1096   : > { %2701 = vmatprep.mubr.msk.bf16.mxu1 %vm3004_vm0, %v3003_v1  ;;  %2698 = vmatpush3.bf16.msra.mxu1 %v2841_v21 }
0x1097   : > { %2699 = vmatprep.subr.bf16.mxu1 %v3003_v1 }
0x109a   : > { %2700 = vmatpush3.bf16.msra.mxu1 %v2842_v27 }
0x109b   : > { %2717 = vmatprep.subr.bf16.mxu1 %v3003_v1 }
0x1148   : > { %v1510_v25 = vpop.f32.mrb[28].mxu1 }
0x1149   : > { %v2651_v26 = vpop.f32.mrb[29].mxu1 }
0x114a   : > { %v1513_v28 = vpop.f32.mrb[30].mxu1 }
0x114b   : > { %v2652_v29 = vpop.f32.mrb[31].mxu1 }
0x1158   : > { %v1631_v30 = vpop.f32.mrb[32].mxu1 }
0x1159   : > { %v2663_v32 = vpop.f32.mrb[33].mxu1 }
0x115a   : > { %v1634_v33 = vpop.f32.mrb[34].mxu1  ;;  %v2410_v32 = vld [vmem:[%s3641_s2 + $0x1d] ss:$0 sm:$0xff] }
0x115b   : > { %v2796_v35 = vpack.i.bf16 %v1634_v33, %v1631_v30  ;;  %v2664_v36 = vpop.f32.mrb[35].mxu1 }
0x115c   : > { %v2411_v36 = vld [vmem:[%s3641_s2 + $0x1e] ss:$0 sm:$0xff] }
0x115d   : > { %2797 = vrot.lane.b32.xlu1 %v2796_v35, %s3648_s27 }
0x1160   : > { %v1752_v37 = vpop.f32.mrb[36].mxu1 }
0x1161   : > { %v2675_v40 = vpop.f32.mrb[37].mxu1 }
0x1162   : > { %v1755_v42 = vpop.f32.mrb[38].mxu1 }
0x1163   : > { %v2801_v43 = vpack.i.bf16 %v1755_v42, %v1752_v37  ;;  %v2676_v44 = vpop.f32.mrb[39].mxu1 }
0x1164   : > { %v2844_v44 = vld [vmem:[%s3640_s1 + $0x108] sm:$0xff]  }
0x1165   : > { %2802 = vrot.lane.b32.xlu0 %v2801_v43, %s3649_s30  ;;  %v2843_v43 = vld [vmem:[%s3640_s1 + $0x100] sm:$0xff]   ;;  %s160_s30 = scalar_lea.vmem [#allocation2], %s159_s26 }
0x1168   : > { %v1873_v45 = vpop.f32.mrb[40].mxu1 }
0x1169   : > { %v2687_v46 = vpop.f32.mrb[41].mxu1 }
0x116a   : > { %v1876_v47 = vpop.f32.mrb[42].mxu1  ;;  %v2846_v46 = vld [vmem:[%s3640_s1 + $0x118] sm:$0xff]  }
0x116b   : > { %v2806_v48 = vpack.i.bf16 %v1876_v47, %v1873_v45  ;;  %v2688_v49 = vpop.f32.mrb[43].mxu1  ;;  %v2845_v45 = vld [vmem:[%s3640_s1 + $0x110] sm:$0xff]   ;;  %v2412_v47 = vld [vmem:[%s3641_s2 + $0x1f] ss:$0 sm:$0xff] }
0x116d   : > { %2807 = vrot.lane.b32.xlu1 %v2806_v48, %s3650_s4  ;;  %s2286_s4 = sshll.u32 %s160_s30, 4  ;;  %s3599_s4 = int_to_ptr.vmem [resolvable:$true] %s2286_s4 }
0x116e   : > { %s2939_s16 = scalar_lea.vmem %s3599_s4, 16  ;;  %p2946_p0 = scmp.lt.s32.totalorder %s3599_s4, %s2944_s20 }
0x116f   : > { %p2940_p11 = scmp.ne.s32.totalorder %s3599_s4, %s2939_s16  ;;  %p2947_p1 = scmp.lt.s32.totalorder %s2945_s24, %s2939_s16 }
0x1171   : > { %p2941_p12 = pnand %p2940_p11, %p3079_p5  ;;  %p2948_p2 = por %p2947_p1, %p2946_p0 }
0x1173   : > { %p2942_p13 = pneg %p2941_p12 }
0x1175   : > { %p2949_p3 = pnand %p2948_p2, %p2942_p13 }
0x11cf   : > { %v2798_v50 = vpop.permute.xlu1 %2797 }
0x11d0   : > { %v2800_v52 = vunpack.i.h.bf16 %v2798_v50  ;;  %v2799_v53 = vunpack.i.l.bf16 %v2798_v50 }
0x11d2   : > { %v1905_v58 = vsel %vm509_vm3, %v1513_v28, %v2800_v52  ;;  %v1904_v60 = vsel %vm509_vm3, %v1510_v25, %v2799_v53 }
0x11d7   : > { %v2803_v51 = vpop.permute.xlu0 %2802 }
0x11d8   : > { %v2805_v11 = vunpack.i.h.bf16 %v2803_v51  ;;  %v2804_v54 = vunpack.i.l.bf16 %v2803_v51 }
0x11da   : > { %v1907_v38 = vsel %vm557_vm5, %v1905_v58, %v2805_v11  ;;  %v1906_v0 = vsel %vm557_vm5, %v1904_v60, %v2804_v54 }
0x11df   : > { %v2808_v55 = vpop.permute.xlu1 %2807 }
0x11e0   : > { %v2810_v62 = vunpack.i.h.bf16 %v2808_v55  ;;  %v2809_v63 = vunpack.i.l.bf16 %v2808_v55 }
0x11e2   : > { %v1909_v56 = vsel %vm1019_vm6, %v1907_v38, %v2810_v62  ;;  %v1908_v2 = vsel %vm1019_vm6, %v1906_v0, %v2809_v63 }
0x11e3   : > { %v1914_v3 = vpack.c.bf16 %v1909_v56, %v1908_v2 }
0x11e5   : > { %2694 = vmatmul.mubr.msk.bf16.vlgmr.msra.gmra.mrb[48].mxu0 %vm404_vm2, %v1914_v3 }
0x11e6   : > { %2713 = vmatprep.mubr.msk.bf16.mxu0 %vm3004_vm0, %v3003_v1  ;;  %2706 = vmatpush3.bf16.msra.mxu0 %v2843_v43 }
0x11e7   : > { %2707 = vmatprep.subr.bf16.mxu0 %v3003_v1 }
0x11ea   : > { %2708 = vmatpush3.bf16.msra.mxu0 %v2844_v44 }
0x11eb   : > { %2709 = vmatprep.subr.bf16.mxu0 %v3003_v1 }
0x11ee   : > { %2710 = vmatpush3.bf16.msra.mxu0 %v2845_v45 }
0x11ef   : > { %2711 = vmatprep.subr.bf16.mxu0 %v3003_v1 }
0x11f2   : > { %2712 = vmatpush3.bf16.msra.mxu0 %v2846_v46 }
0x12b8   : > { %v1964_v39 = vpop.f32.mrb[48].mxu0 }
0x12b9   : > { %v1971_v4 = vadd.f32 %v1964_v39, %v3379_v57  ;;  %v2695_v31 = vpop.f32.mrb[49].mxu0  ;;  %v2421_v39 = vld [vmem:[%s3641_s2 + $0x20] ss:$0 sm:$0xff] }
0x12ba   : > { %v1967_v5 = vpop.f32.mrb[50].mxu0 }
0x12bb   : > { %v3518_v6 = vadd.f32 %v2409_v59, %v1971_v4  ;;  %v1972_v7 = vadd.f32 %v1967_v5, %v3382_v61  ;;  %v2696_v8 = vpop.f32.mrb[51].mxu0 }
0x12bd   : > { %v3521_v9 = vadd.f32 %v2409_v59, %v1972_v7  ;;  %v1982_v10 = vsel %vm404_vm2, %v3518_v6, 0.0 }
0x12be   : > { %1983 = vadd.xlane.f32.xlu0 %v1982_v10 }
0x12bf   : > { %v1985_v12 = vsel %vm404_vm2, %v3521_v9, 0.0 }
0x12c0   : > { %1986 = vadd.xlane.f32.xlu1 %v1985_v12 }
0x134b   : > { %v1984_v13 = vpop.xlane.xlu0 %1983 }
0x134c   : > { %v1988_v14 = vmul.f32 0.03125, %v1984_v13 }
0x134d   : > { %v1987_v57 = vpop.xlane.xlu1 %1986 }
0x134e   : > { %v1990_v15 = vsub.f32 %v3518_v6, %v1988_v14  ;;  %v1989_v16 = vmul.f32 0.03125, %v1987_v57 }
0x1350   : > { %v1991_v17 = vsub.f32 %v3521_v9, %v1989_v16  ;;  %v1992_v61 = vmul.f32 %v1990_v15, %v1990_v15 }
0x1352   : > { %v1994_v18 = vsel %vm404_vm2, %v1992_v61, 0.0  ;;  %v1993_v19 = vmul.f32 %v1991_v17, %v1991_v17 }
0x1353   : > { %1995 = vadd.xlane.f32.xlu0 %v1994_v18 }
0x1354   : > { %v1997_v20 = vsel %vm404_vm2, %v1993_v19, 0.0 }
0x1357   : > { %1998 = vadd.xlane.f32.xlu0 %v1997_v20 }
0x13e0   : > { %v1996_v22 = vpop.xlane.xlu0 %1995 }
0x13e1   : > { %v2000_v23 = vmul.f32 0.03125, %v1996_v22 }
0x13e3   : > { %v2002_v24 = vadd.f32 1e-05, %v2000_v23  ;;  %v2847_v23 = vld [vmem:[%s3640_s1 + $0x120] sm:$0xff]  }
0x13e4   : > { %v1999_v25 = vpop.xlane.xlu0 %1998 }
0x13e5   : > { %2929 = vrsqrt.f32 %v2002_v24  ;;  %v2001_v26 = vmul.f32 0.03125, %v1999_v25  ;;  %v2848_v24 = vld [vmem:[%s3640_s1 + $0x128] sm:$0xff]  }
0x13e7   : > { %v2003_v28 = vadd.f32 1e-05, %v2001_v26 }
0x13e9   : > { %2931 = vrsqrt.f32 %v2003_v28 }
0x13ef   : > { %v2930_v29 = vpop.eup %2929 }
0x13f0   : > { %v2006_v30 = vmul.f32 %v2930_v29, %v1990_v15 }
0x13f2   : > { %v2012_v34 = vmul.f32 %v2410_v32, %v2006_v30  ;;  %v2194_v30 = vld [vmem:[%s3641_s2 + $0x21] sm:$0x1] }
0x13f3   : > { %v2932_v33 = vpop.eup %2931 }
0x13f4   : > { %v2007_v35 = vmul.f32 %v2932_v33, %v1991_v17  ;;  %v2018_v40 = vadd.f32 %v2411_v36, %v2012_v34  ;;  %v2195_v33 = vld [vmem:[%s3641_s2 + $0x22] sm:$0x1] }
0x13f6   : > { %v2013_v37 = vmul.f32 %v2410_v32, %v2007_v35 }
0x13f8   : > { %v2019_v41 = vadd.f32 %v2411_v36, %v2013_v37 }
0x13fa   : > { %v2024_v42 = vpack.c.bf16 %v2019_v41, %v2018_v40 }
0x13fc   : > { %2702 = vmatmul.mubr.msk.bf16.vlgmr.msra.gmra.mrb[44].mxu1 %vm404_vm2, %v2024_v42 }
0x13fd   : > { %2721 = vmatprep.mubr.msk.bf16.mxu1 %vm3004_vm0, %v3003_v1  ;;  %2718 = vmatpush3.bf16.msra.mxu1 %v2847_v23 }
0x13fe   : > { %2719 = vmatprep.subr.bf16.mxu1 %v3003_v1  ;;  %v2216_v1 = vld [vmem:[%s3641_s2 + $0x23] sm:$0x1] }
0x1401   : > { %2720 = vmatpush3.bf16.msra.mxu1 %v2848_v24 }
0x14cf   : > { %v2079_v48 = vpop.f32.mrb[44].mxu1 }
0x14d0   : > { %v2080_v49 = vadd.f32 %v2412_v47, %v2079_v48  ;;  %v2703_v50 = vpop.f32.mrb[45].mxu1 }
0x14d1   : > { %v2082_v51 = vpop.f32.mrb[46].mxu1 }
0x14d2   : > { %v2088_v52 = vmul.f32 0.70710677, %v2080_v49  ;;  %v2083_v53 = vadd.f32 %v2412_v47, %v2082_v51  ;;  %v2704_v11 = vpop.f32.mrb[47].mxu1  ;;  %v2086_v62 = vmul.f32 0.5, %v2080_v49 }
0x14d4   : > { %2933 = verf.f32 %v2088_v52  ;;  %v2089_v54 = vmul.f32 0.70710677, %v2083_v53  ;;  %v2087_v63 = vmul.f32 0.5, %v2083_v53 }
0x14d6   : > { %2935 = verf.f32 %v2089_v54 }
0x14de   : > { %v2934_v55 = vpop.eup %2933 }
0x14df   : > { %v2092_v58 = vadd.f32 1.0, %v2934_v55 }
0x14e0   : > { %v2936_v60 = vpop.eup %2935 }
0x14e1   : > { %v2093_v38 = vadd.f32 1.0, %v2936_v60  ;;  %v2094_v0 = vmul.f32 %v2092_v58, %v2086_v62 }
0x14e3   : > { %v2095_v56 = vmul.f32 %v2093_v38, %v2087_v63 }
0x14e5   : > { %v2104_v2 = vpack.c.bf16 %v2095_v56, %v2094_v0 }
0x14e7   : > { %2714 = vmatmul.mubr.msk.bf16.vlgmr.msra.gmra.mrb[52].mxu0 %vm1241_vm7, %v2104_v2 }
0x15ba   : > { %v2166_v3 = vpop.f32.mrb[52].mxu0 }
0x15bb   : > { %v2173_v59 = vadd.f32 %v2166_v3, %v3518_v6  ;;  %v2715_v4 = vpop.f32.mrb[53].mxu0 }
0x15bc   : > { %v2169_v31 = vpop.f32.mrb[54].mxu0 }
0x15bd   : > { %v2180_v5 = vadd.f32 %v2421_v39, %v2173_v59  ;;  %v2174_v7 = vadd.f32 %v2169_v31, %v3521_v9  ;;  %v2716_v8 = vpop.f32.mrb[55].mxu0 }
0x15bf   : > { %v2181_v10 = vadd.f32 %v2421_v39, %v2174_v7  ;;  %v2182_v12 = vsel %vm404_vm2, %v2180_v5, 0.0 }
0x15c1   : > { %v2184_v13 = vsel %vm2183_vm8, %v2181_v10, 0.0 }
0x15c2   : > { %v2185_v14 = vadd.f32 %v2184_v13, %v2182_v12 }
0x15c4   : > { %v2186_v57 = vrot.slane %v2185_v14, 4 }
0x15c6   : > { %v2187_v15 = vadd.f32 %v2186_v57, %v2185_v14 }
0x15c8   : > { %v2188_v16 = vrot.slane %v2187_v15, 2 }
0x15ca   : > { %v2189_v17 = vadd.f32 %v2188_v16, %v2187_v15 }
0x15cc   : > { %v2190_v61 = vrot.slane %v2189_v17, 1 }
0x15ce   : > { %v2191_v18 = vadd.f32 %v2190_v61, %v2189_v17 }
0x15d0   : > { %v2193_v19 = vmul.f32 0.11111111, %v2191_v18 }
0x15d2   : > { %v2196_v6 = vsel %vm404_vm2, %v2193_v19, 0.0 }
0x15d3   : > { %2197 = vadd.xlane.f32.xlu0 %v2196_v6 }
0x1660   : > { %v2198_v20 = vpop.xlane.xlu0 %2197 }
0x1661   : > { %v2199_v21 = vmul.f32 0.03125, %v2198_v20 }
0x1663   : > { %v2200_v9 = vsub.f32 %v2193_v19, %v2199_v21 }
0x1665   : > { %v2201_v27 = vmul.f32 %v2200_v9, %v2200_v9 }
0x1667   : > { %v2202_v22 = vsel %vm404_vm2, %v2201_v27, 0.0 }
0x1668   : > { %2203 = vadd.xlane.f32.xlu1 %v2202_v22 }
0x16f5   : > { %v2204_v25 = vpop.xlane.xlu1 %2203 }
0x16f6   : > { %v2205_v26 = vmul.f32 0.03125, %v2204_v25 }
0x16f8   : > { %v2206_v28 = vadd.f32 1e-05, %v2205_v26 }
0x16fa   : > { %2937 = vrsqrt.f32 %v2206_v28 }
0x1704   : > { %v2938_v29 = vpop.eup %2937 }
0x1705   : > { %v2208_v32 = vmul.f32 %v2938_v29, %v2200_v9 }
0x1707   : > { %v2209_v34 = vmul.f32 %v2208_v32, %v2194_v30 }
0x1709   : > { %v2210_v35 = vadd.f32 %v2209_v34, %v2195_v33 }
0x170b   : > { %v2215_v36 = vpack.c.bf16 %v2210_v35, %v2210_v35 }
0x170d   : > { %2722 = vmatmul.mubr.msk.bf16.vlgmr.msra.gmra.mrb[48].mxu1 %vm404_vm2, %v2215_v36 }
0x17e0   : > { %v2266_v37 = vpop.f32.mrb[48].mxu1 }
0x17e1   : > { %v2267_v40 = vadd.f32 %v2266_v37, %v2216_v1  ;;  %v2723_v41 = vpop.f32.mrb[49].mxu1 }
0x17e2   : > { %v2269_v42 = vpop.f32.mrb[50].mxu1 }
0x17e3   : > { %2272 = vst [vmem:[%s160_s30] sm:$0x1] %v2267_v40  ;;  %v2724_v43 = vpop.f32.mrb[51].mxu1 }
0x17e4   : > { %2952 = shalt.err (!%p2949_p3)
}
0x17e5   : > { %s2953_s17 = scalar_lea.hbm %s3597_s7, 16  ;;  %s2957_s9 = scalar_lea.hbm %s3642_s3, 32 }
0x17e6   : > { %p2954_p4 = scmp.ne.s32.totalorder %s3597_s7, %s2953_s17  ;;  %p2958_p9 = scmp.lt.u32.totalorder %s3597_s7, %s3642_s3 }
0x17e7   : > { %p2959_p10 = scmp.lt.u32.totalorder %s2957_s9, %s2953_s17  ;;  %p2961_p12 = scmp.lt.u32.totalorder %s2953_s17, %s3597_s7 }
0x17e8   : > { %p2955_p7 = pnand %p2954_p4, %p3079_p5 }
0x17e9   : > { %p2960_p11 = por %p2959_p10, %p2958_p9 }
0x17ea   : > { %p2956_p8 = pneg %p2955_p7 }
0x17eb   : > { %p2962_p13 = por %p2961_p12, %p2960_p11 }
0x17ed   : > { %p2963_p0 = pnand %p2962_p13, %p2956_p8 }
0x17ef   : > { %2966 = shalt.err (!%p2963_p0)
}
0x17f0   : > { %2725 = dma.vmem_to_hbm [thread:$0]  (%p3079_p5), %s3599_s4, 16, %s3597_s7, %s2274_s8  }
0x17f1 PF: > { %p2731_p1 = scmp.ge.s32.totalorder %s3001_s15, 2  ;;  %s2298_s27 = sand.u32 1, %s2989_s12  }
0x17f2   : > { %s2299_s28 = scalar_lea.sflag [#allocation3], %s2298_s27 }
0x17f3   : > { %p2728_p2 = pnand %p2731_p1, %p3083_p6 }
0x17f5   : > { %2984 = dma.done.wait (!%p2728_p2), %s2299_s28, 16  }
0x17f6   : > { %2986 = vsyncadd (!%p2728_p2), %s2299_s28, 4294967280  ;;  %p13_p3 = scmp.ge.s32.totalorder %s3066_s18, 4   ;;  %s3651_s12 = smov %s2993_s13 }
0x17f7   : > { %s3652_s13 = smov %s2997_s14  ;;  %s3653_s14 = smov %s3077_s21 }
0x17f8   : > { %s3654_s15 = smov %s3066_s18  ;;  %15 = sbr.rel (!%p13_p3) target bundleno = 3 (0x3), region = 67 }
0x17ff   :  { %2303 = vsyncpa [#allocation3], 1 }
0x1800   :  { %2305 = vsyncpa [#allocation3 + $0x1], 1 }

</bundles_post_ra>
